<compile_context>
chip_gen: v7x
topology: tpu7x:2x2x1
jax: 0.10.0
libtpu: 0.0.40
codegen_flags: <defaults>
</compile_context>

<pallas_src>
import jax
import jax.numpy as jnp
from jax import lax
from jax.experimental import pallas as pl
from jax.experimental.pallas import tpu as pltpu


def _pick_tile(n, candidates):
    """Largest candidate tile that divides n; else the full extent."""
    for c in candidates:
        if n % c == 0:
            return c
    return n


def _tpu_vmem_capacity_bytes():
    """Physical VMEM per core; 128 MiB (v5e/v6e) fallback if the query fails."""
    try:
        return int(pltpu.get_tpu_info().vmem_capacity_bytes)
    except Exception:
        return 128 << 20


def _tpu_has_bf16_vector_units():
    """v6e/v7x have bf16 VPU/EUP; v2-v5 do not (exp/scale stay f32 there)."""
    try:
        kind = jax.devices()[0].device_kind.lower()
        return not any(tag in kind for tag in ("v2", "v3", "v4", "v5"))
    except Exception:
        return True


# ----------------------------------------------------------------------------
# Kernel A: per-batch attention + trans_conv + fused BN partial statistics.
#   grid = (B,); one (C, N) slab per grid step, query rows processed in
#   stripes of `tq` so VMEM stays bounded for large N.
# ----------------------------------------------------------------------------
def _make_attn_kernel(tq, n_stripes, unroll, approx_recip, softmax_bf16):
    pd = jnp.bfloat16 if softmax_bf16 else jnp.float32   # softmax prob dtype
    c0 = (((0,), (0,)), ((), ()))        # contract dim 0 of both operands

    def kernel(x_ref, wqt_ref, wvt_ref, bv_ref, wt_ref, bt_ref,   # inputs
               t_ref, stats_ref,                                   # outputs
               k_s, qt_s, vt_s, num_s, col_s):                     # scratch
        cd = k_s.dtype                   # MXU operand dtype (f32 or bf16)
        C = x_ref.shape[1]

        xc = x_ref[0].astype(cd)         # (C, N)

        # 1x1 convs == channel matmuls.  q_conv and k_conv share weights (no
        # bias), so k_s and qt_s hold the same values transposed; both are
        # kept as two cheap MXU matmuls (C*C4*N each, <5% of the attention
        # FLOPs) so the stripe loop only ever slices the sublane dim.
        k_s[...] = lax.dot_general(
            wqt_ref[...], xc, c0,
            preferred_element_type=jnp.float32).astype(cd)             # (C4, N)
        qt_s[...] = lax.dot_general(
            xc, wqt_ref[...], c0,
            preferred_element_type=jnp.float32).astype(cd)             # (N, C4)
        vt_s[...] = (lax.dot_general(
            xc, wvt_ref[...], c0,
            preferred_element_type=jnp.float32) + bv_ref[...]).astype(cd)  # (N, C)

        num_s[...] = jnp.zeros_like(num_s)   # accumulates x_v @ softmax(E)
        col_s[...] = jnp.zeros_like(col_s)   # accumulates softmax column sums

        def stripe(si, carry):
            q0 = pl.multiple_of(si * tq, tq)
            q_blk = qt_s[pl.ds(q0, tq), :]                          # (tq, C4)
            e = jnp.dot(q_blk, k_s[...],
                        preferred_element_type=jnp.float32)          # (tq, N)
            m = jnp.max(e, axis=-1, keepdims=True)
            # bf16 exp on v6e/v7x (EUP/VPU relief); f32 elsewhere.
            p = jnp.exp((e - m).astype(pd))                          # (tq, N)
            r = pl.reciprocal(
                jnp.sum(p, axis=-1, keepdims=True, dtype=jnp.float32),
                approx=approx_recip)                                 # (tq, 1)
            # Row reciprocal folded into v (a (tq, C) scaling, ~N/C cheaper
            # than scaling p); p itself stays un-normalized.
            v_blk = vt_s[pl.ds(q0, tq), :] * r.astype(cd)            # (tq, C)
            num_s[...] += lax.dot_general(
                v_blk, p.astype(cd), c0,
                preferred_element_type=jnp.float32)                  # (C, N)
            # Column sums of the row-normalized softmax as a rank-1 MXU
            # matvec r^T @ p (query-axis reduction moved off the VPU/XLU).
            col_s[...] += lax.dot_general(
                r.astype(cd), p.astype(cd), c0,
                preferred_element_type=jnp.float32)                  # (1, N)
            return carry

        lax.fori_loop(0, n_stripes, stripe, 0, unroll=unroll)

        # attention / (1e-9 + attention.sum(dim=1)) folded into one per-key
        # scaling of the accumulated numerator.
        cinv = pl.reciprocal(1e-9 + col_s[...], approx=approx_recip)   # (1, N)
        x_r = num_s[...] * cinv                                         # (C, N)

        d = (x_ref[0] - x_r).astype(cd)
        t = jnp.dot(wt_ref[...], d,
                    preferred_element_type=jnp.float32) + bt_ref[...]   # (C, N)
        t_ref[0] = t.astype(t_ref.dtype)

        # Fused BatchNorm statistics, packed lane-dense as (2, C): rows are
        # [sum(t), sum(t*t)] over N.  The (C, 2) -> (2, C) relayout is done on
        # the MXU via an identity matmul (negligible C^2 MACs, no XLU
        # transpose), so the store is a single unmasked lane-dense DMA.
        s = jnp.sum(t, axis=-1, keepdims=True)                          # (C, 1)
        ss = jnp.sum(t * t, axis=-1, keepdims=True)                     # (C, 1)
        pair = jnp.concatenate([s, ss], axis=1)                         # (C, 2)
        eye_c = jnp.eye(C, dtype=jnp.float32)
        stats_ref[0] = lax.dot_general(
            pair, eye_c, c0, preferred_element_type=jnp.float32)        # (2, C)

    return kernel


# ----------------------------------------------------------------------------
# Kernel B: normalize + ReLU + residual, tiled over (B, N).
#   scale/shift (precomputed from the fused statistics) fold gamma/beta/mean/
#   var into a single multiply-add per element.  Pure HBM-bound pass.
# ----------------------------------------------------------------------------
def _bn_relu_res_kernel(x_ref, t_ref, scale_ref, shift_ref, o_ref):
    y = (t_ref[...].astype(jnp.float32) * scale_ref[...][None]
         + shift_ref[...][None])
    o_ref[...] = x_ref[...] + jnp.maximum(y, 0.0)


# ----------------------------------------------------------------------------
# Wrapper
# ----------------------------------------------------------------------------
def _transformer_layer_impl(x, wq, wv, bv, wt, bt, gamma, beta, *,
                            mxu_bf16=True):
    B, C, N = x.shape
    C4 = wq.shape[0]

    cd = jnp.bfloat16 if mxu_bf16 else jnp.float32     # MXU operand dtype
    t_dtype = jnp.bfloat16 if mxu_bf16 else jnp.float32  # t HBM round-trip dtype
    softmax_bf16 = bool(mxu_bf16 and _tpu_has_bf16_vector_units())
    vmem_cap = _tpu_vmem_capacity_bytes()

    # Query stripe for Kernel A.  Real PCT workloads use 128-aligned N
    # (1024/2048); small test shapes fall back to a single full-extent stripe.
    # TODO(synk): pad N to a multiple of 128 (or add a remainder stripe)
    # instead of materializing a full (N, N) stripe when N is unaligned.
    if N % 128 == 0:
        small_vmem = vmem_cap <= (64 << 20)           # v7x-class parts
        if N % 256 == 0 and not (small_vmem and N >= 4096):
            tq = 256
        else:
            tq = 128
    else:
        tq = N
    n_stripes = max(N // tq, 1)
    unroll = min(2, n_stripes)

    # Footprint-derived VMEM budget for Kernel A (leave headroom for the
    # compiler's internal scratch; never exceed half of physical VMEM).
    csz = 2 if mxu_bf16 else 4
    psz = 2 if softmax_bf16 else 4
    tsz = 2 if mxu_bf16 else 4
    fp = 0
    fp += 2 * C * N * 4                                   # x blocks (dbl-buf)
    fp += 2 * C * N * tsz                                  # t blocks (dbl-buf)
    fp += 2 * 2 * C * 4                                    # stats blocks
    fp += 2 * ((C * C4 + 2 * C * C) * csz + 2 * C * 4)     # weights / biases
    fp += (C4 * N + N * C4 + N * C) * csz                  # k_s, qt_s, vt_s
    fp += C * N * 4 + N * 4                                # num_s, col_s
    fp += unroll * tq * N * (4 + psz + csz)                # live e/p stripe tmp
    vmem_a = int(max(min(int(fp * 1.3) + (4 << 20), vmem_cap // 2), 16 << 20))

    # Point tile for Kernel B: whole (C, N) per batch when the double-buffered
    # x/t/out slabs fit comfortably, else the largest 128-multiple tile.
    kb_bytes = 2 * C * (4 + tsz + 4)                       # per-point, dbl-buf
    if kb_bytes * N <= (14 << 20):
        tn = N
    else:
        tn = _pick_tile(N, (2048, 1024, 512, 256, 128))

    wqt = wq.T.astype(cd)                 # (C, C4)  (q_conv == k_conv weight)
    wvt = wv.T.astype(cd)                 # (C, C)
    wtc = wt.astype(cd)                   # (C, C)
    bv2 = bv.reshape(1, C).astype(jnp.float32)
    bt2 = bt.reshape(C, 1).astype(jnp.float32)

    # ---- Kernel A: attention + trans_conv + fused BN partial stats ----
    # grid=(B,) "parallel": shards batches across v7x's 2 TensorCores when the
    # per-chip batch is >= 2 (no benefit/penalty on single-TC v5e/v6e).
    t, stats = pl.pallas_call(
        _make_attn_kernel(tq, n_stripes, unroll,
                          approx_recip=mxu_bf16, softmax_bf16=softmax_bf16),
        out_shape=(
            jax.ShapeDtypeStruct((B, C, N), t_dtype),     # trans_conv(x - x_r)
            jax.ShapeDtypeStruct((B, 2, C), jnp.float32),  # [sum(t); sum(t*t)]
        ),
        grid_spec=pltpu.PrefetchScalarGridSpec(
            num_scalar_prefetch=0,
            grid=(B,),
            in_specs=[
                pl.BlockSpec((1, C, N), lambda b: (b, 0, 0)),   # x
                pl.BlockSpec((C, C4), lambda b: (0, 0)),        # wq^T (== wk^T)
                pl.BlockSpec((C, C), lambda b: (0, 0)),         # wv^T
                pl.BlockSpec((1, C), lambda b: (0, 0)),         # bv
                pl.BlockSpec((C, C), lambda b: (0, 0)),         # wt
                pl.BlockSpec((C, 1), lambda b: (0, 0)),         # bt
            ],
            out_specs=(
                pl.BlockSpec((1, C, N), lambda b: (b, 0, 0)),
                pl.BlockSpec((1, 2, C), lambda b: (b, 0, 0)),
            ),
            scratch_shapes=[
                pltpu.VMEM((C4, N), cd),            # keys (RHS of energy)
                pltpu.VMEM((N, C4), cd),            # q^T  (sublane-sliced stripes)
                pltpu.VMEM((N, C), cd),             # v^T  (sublane-sliced stripes)
                pltpu.VMEM((C, N), jnp.float32),    # x_v @ attention accumulator
                pltpu.VMEM((1, N), jnp.float32),    # attention column sums
            ],
        ),
        compiler_params=pltpu.CompilerParams(
            dimension_semantics=("parallel",),
            vmem_limit_bytes=vmem_a),
    )(x, wqt, wvt, bv2, wtc, bt2)

    # Tiny cross-batch reduction of the fused statistics (C-length vectors).
    # Note: E[t^2] - E[t]^2 variance in f32, clamped at 0 (guards cancellation).
    cnt = jnp.float32(B * N)
    sums = jnp.sum(stats, axis=0)                      # (2, C)
    mean = sums[0] / cnt
    var = jnp.maximum(sums[1] / cnt - mean * mean, 0.0)
    inv = lax.rsqrt(var + 1e-5) * gamma
    scale = inv.reshape(C, 1).astype(jnp.float32)
    shift = (beta - mean * inv).reshape(C, 1).astype(jnp.float32)

    # ---- Kernel B: tiled normalize + ReLU + residual ----
    # (input_output_aliases on x was considered but x is a jit parameter, so
    #  XLA would insert a defensive copy; the bf16 t round-trip already cuts
    #  the HBM traffic of this pass.)
    out = pl.pallas_call(
        _bn_relu_res_kernel,
        out_shape=jax.ShapeDtypeStruct((B, C, N), jnp.float32),
        grid_spec=pltpu.PrefetchScalarGridSpec(
            num_scalar_prefetch=0,
            grid=(B, N // tn),
            in_specs=[
                pl.BlockSpec((1, C, tn), lambda b, n: (b, 0, n)),   # x
                pl.BlockSpec((1, C, tn), lambda b, n: (b, 0, n)),   # t
                pl.BlockSpec((C, 1), lambda b, n: (0, 0)),          # scale
                pl.BlockSpec((C, 1), lambda b, n: (0, 0)),          # shift
            ],
            out_specs=pl.BlockSpec((1, C, tn), lambda b, n: (b, 0, n)),
        ),
        compiler_params=pltpu.CompilerParams(
            dimension_semantics=("parallel", "parallel")),
    )(x, t, scale, shift)
    return out


transformer_layer = jax.jit(_transformer_layer_impl,
                            static_argnames=("mxu_bf16",))


# Pure-JAX reference (f32) mirroring the PyTorch forward for sanity checking.
def _reference(x, wq, wv, bv, wt, bt, gamma, beta):
    xq = jnp.einsum("oc,bcn->bon", wq, x)                       # (B, C4, N)
    xk = xq                                                      # tied weights
    xv = jnp.einsum("oc,bcn->bon", wv, x) + bv[None, :, None]    # (B, C, N)
    energy = jnp.einsum("bcn,bcm->bnm", xq, xk)                  # (B, N, N)
    att = jax.nn.softmax(energy, axis=-1)
    att = att / (1e-9 + jnp.sum(att, axis=1, keepdims=True))
    x_r = jnp.einsum("bcn,bnm->bcm", xv, att)
    t = jnp.einsum("oc,bcn->bon", wt, x - x_r) + bt[None, :, None]
    mean = jnp.mean(t, axis=(0, 2), keepdims=True)
    var = jnp.mean((t - mean) ** 2, axis=(0, 2), keepdims=True)
    y = (t - mean) * lax.rsqrt(var + 1e-5)
    y = y * gamma[None, :, None] + beta[None, :, None]
    return x + jnp.maximum(y, 0.0)


if __name__ == "__main__":
    B, C, N = 2, 32, 64
    C4 = C // 4

    key = jax.random.PRNGKey(0)
    ks = jax.random.split(key, 8)
    x = jax.random.normal(ks[0], (B, C, N), jnp.float32)
    wq = jax.random.normal(ks[1], (C4, C), jnp.float32) * 0.2    # q == k weight
    wv = jax.random.normal(ks[2], (C, C), jnp.float32) * 0.2
    bv = jax.random.normal(ks[3], (C,), jnp.float32) * 0.1
    wt = jax.random.normal(ks[4], (C, C), jnp.float32) * 0.2
    bt = jax.random.normal(ks[5], (C,), jnp.float32) * 0.1
    gamma = 1.0 + 0.1 * jax.random.normal(ks[6], (C,), jnp.float32)
    beta = 0.1 * jax.random.normal(ks[7], (C,), jnp.float32)

    ref = _reference(x, wq, wv, bv, wt, bt, gamma, beta)

    # Strict correctness check: f32 MXU path vs the f32 reference.
    out_f32 = jax.block_until_ready(
        transformer_layer(x, wq, wv, bv, wt, bt, gamma, beta, mxu_bf16=False))
    assert out_f32.shape == (B, C, N)
    assert jnp.allclose(out_f32, ref, rtol=2e-3, atol=2e-3), "f32 mismatch"

    # Throughput-policy sanity check: bf16 MXU operands / softmax / t (fast path).
    out_bf16 = jax.block_until_ready(
        transformer_layer(x, wq, wv, bv, wt, bt, gamma, beta, mxu_bf16=True))
    assert out_bf16.shape == (B, C, N)
    assert jnp.allclose(out_bf16, ref, rtol=2.5e-1, atol=2.5e-1), "bf16 mismatch"

    print("KERNEL_OK")
</pallas_src>

<mosaic_0001>
module attributes {stable_mosaic.version = 11 : i64} {
  func.func @kernel(%arg0: i32, %arg1: memref<1x32x64xf32, #tpu.memory_space<vmem>>, %arg2: memref<32x8xf32, #tpu.memory_space<vmem>>, %arg3: memref<32x32xf32, #tpu.memory_space<vmem>>, %arg4: memref<1x32xf32, #tpu.memory_space<vmem>>, %arg5: memref<32x32xf32, #tpu.memory_space<vmem>>, %arg6: memref<32x1xf32, #tpu.memory_space<vmem>>, %arg7: memref<1x32x64xf32, #tpu.memory_space<vmem>>, %arg8: memref<1x2x32xf32, #tpu.memory_space<vmem>>, %arg9: memref<8x64xf32, #tpu.memory_space<vmem>>, %arg10: memref<64x8xf32, #tpu.memory_space<vmem>>, %arg11: memref<64x32xf32, #tpu.memory_space<vmem>>, %arg12: memref<32x64xf32, #tpu.memory_space<vmem>>, %arg13: memref<1x64xf32, #tpu.memory_space<vmem>>) attributes {dimension_semantics = [#tpu.dimension_semantics<parallel>], iteration_bounds = array<i64: 2>, scalar_prefetch = 0 : i64, scratch_operands = 5 : i64, tpu.core_type = #tpu.core_type<tc>, window_params = [{transform_indices = @transform_0, window_bounds = array<i64: 1, 32, 64>}, {pipeline_mode = #tpu.pipeline_mode<synchronous>, transform_indices = @transform_1, window_bounds = array<i64: 32, 8>}, {pipeline_mode = #tpu.pipeline_mode<synchronous>, transform_indices = @transform_2, window_bounds = array<i64: 32, 32>}, {pipeline_mode = #tpu.pipeline_mode<synchronous>, transform_indices = @transform_3, window_bounds = array<i64: 1, 32>}, {pipeline_mode = #tpu.pipeline_mode<synchronous>, transform_indices = @transform_4, window_bounds = array<i64: 32, 32>}, {pipeline_mode = #tpu.pipeline_mode<synchronous>, transform_indices = @transform_5, window_bounds = array<i64: 32, 1>}, {transform_indices = @transform_6, window_bounds = array<i64: 1, 32, 64>}, {transform_indices = @transform_7, window_bounds = array<i64: 1, 2, 32>}]} {
    %c0 = arith.constant 0 : index
    %c0_0 = arith.constant 0 : index
    %c0_1 = arith.constant 0 : index
    %0 = vector.load %arg1[%c0, %c0_0, %c0_1] : memref<1x32x64xf32, #tpu.memory_space<vmem>>, vector<1x32x64xf32>
    %1 = vector.shape_cast %0 : vector<1x32x64xf32> to vector<32x64xf32>
    %c0_2 = arith.constant 0 : index
    %c0_3 = arith.constant 0 : index
    %2 = vector.load %arg2[%c0_2, %c0_3] : memref<32x8xf32, #tpu.memory_space<vmem>>, vector<32x8xf32>
    %cst = arith.constant dense<0.000000e+00> : vector<8x64xf32>
    %3 = tpu.matmul %2, %1, %cst {dimension_numbers = #tpu.dot_dimension_numbers<[0], [0], [1], [1], [0, 1, 1, 1], [], []>} : vector<32x8xf32>, vector<32x64xf32>, vector<8x64xf32> -> vector<8x64xf32>
    %c0_4 = arith.constant 0 : index
    %c0_5 = arith.constant 0 : index
    %4 = vector.load %arg9[%c0_4, %c0_5] : memref<8x64xf32, #tpu.memory_space<vmem>>, vector<8x64xf32>
    tpu.vector_store %arg9[%c0_4, %c0_5], %3 {strides = array<i32>} : memref<8x64xf32, #tpu.memory_space<vmem>>, vector<8x64xf32>,
    %c0_6 = arith.constant 0 : index
    %c0_7 = arith.constant 0 : index
    %5 = vector.load %arg2[%c0_6, %c0_7] : memref<32x8xf32, #tpu.memory_space<vmem>>, vector<32x8xf32>
    %cst_8 = arith.constant dense<0.000000e+00> : vector<64x8xf32>
    %6 = tpu.matmul %1, %5, %cst_8 {dimension_numbers = #tpu.dot_dimension_numbers<[0], [0], [1], [1], [0, 1, 1, 1], [], []>} : vector<32x64xf32>, vector<32x8xf32>, vector<64x8xf32> -> vector<64x8xf32>
    %c0_9 = arith.constant 0 : index
    %c0_10 = arith.constant 0 : index
    %7 = vector.load %arg10[%c0_9, %c0_10] : memref<64x8xf32, #tpu.memory_space<vmem>>, vector<64x8xf32>
    tpu.vector_store %arg10[%c0_9, %c0_10], %6 {strides = array<i32>} : memref<64x8xf32, #tpu.memory_space<vmem>>, vector<64x8xf32>,
    %c0_11 = arith.constant 0 : index
    %c0_12 = arith.constant 0 : index
    %8 = vector.load %arg3[%c0_11, %c0_12] : memref<32x32xf32, #tpu.memory_space<vmem>>, vector<32x32xf32>
    %cst_13 = arith.constant dense<0.000000e+00> : vector<64x32xf32>
    %9 = tpu.matmul %1, %8, %cst_13 {dimension_numbers = #tpu.dot_dimension_numbers<[0], [0], [1], [1], [0, 1, 1, 1], [], []>} : vector<32x64xf32>, vector<32x32xf32>, vector<64x32xf32> -> vector<64x32xf32>
    %c0_14 = arith.constant 0 : index
    %c0_15 = arith.constant 0 : index
    %10 = vector.load %arg4[%c0_14, %c0_15] : memref<1x32xf32, #tpu.memory_space<vmem>>, vector<1x32xf32>
    %11 = vector.broadcast %10 : vector<1x32xf32> to vector<64x32xf32>
    %12 = arith.addf %9, %11 : vector<64x32xf32>
    %c0_16 = arith.constant 0 : index
    %c0_17 = arith.constant 0 : index
    %13 = vector.load %arg11[%c0_16, %c0_17] : memref<64x32xf32, #tpu.memory_space<vmem>>, vector<64x32xf32>
    tpu.vector_store %arg11[%c0_16, %c0_17], %12 {strides = array<i32>} : memref<64x32xf32, #tpu.memory_space<vmem>>, vector<64x32xf32>,
    %cst_18 = arith.constant 0.000000e+00 : f32
    %14 = vector.broadcast %cst_18 : f32 to vector<32x64xf32>
    %c0_19 = arith.constant 0 : index
    %c0_20 = arith.constant 0 : index
    %15 = vector.load %arg12[%c0_19, %c0_20] : memref<32x64xf32, #tpu.memory_space<vmem>>, vector<32x64xf32>
    tpu.vector_store %arg12[%c0_19, %c0_20], %14 {strides = array<i32>} : memref<32x64xf32, #tpu.memory_space<vmem>>, vector<32x64xf32>,
    %cst_21 = arith.constant 0.000000e+00 : f32
    %16 = vector.broadcast %cst_21 : f32 to vector<1x64xf32>
    %c0_22 = arith.constant 0 : index
    %c0_23 = arith.constant 0 : index
    %17 = vector.load %arg13[%c0_22, %c0_23] : memref<1x64xf32, #tpu.memory_space<vmem>>, vector<1x64xf32>
    tpu.vector_store %arg13[%c0_22, %c0_23], %16 {strides = array<i32>} : memref<1x64xf32, #tpu.memory_space<vmem>>, vector<1x64xf32>,
    %c0_i32 = arith.constant 0 : i32
    %c64_i32 = arith.constant 64 : i32
    %18 = arith.muli %c0_i32, %c64_i32 : i32
    %19 = tpu.assume_multiple %18, 64 : i32
    %20 = arith.index_cast %19 : i32 to index
    %c0_24 = arith.constant 0 : index
    %21 = vector.load %arg10[%20, %c0_24] : memref<64x8xf32, #tpu.memory_space<vmem>>, vector<64x8xf32>
    %c0_25 = arith.constant 0 : index
    %c0_26 = arith.constant 0 : index
    %22 = vector.load %arg9[%c0_25, %c0_26] : memref<8x64xf32, #tpu.memory_space<vmem>>, vector<8x64xf32>
    %cst_27 = arith.constant dense<0.000000e+00> : vector<64x64xf32>
    %23 = tpu.matmul %21, %22, %cst_27 {dimension_numbers = #tpu.dot_dimension_numbers<[1], [0], [0], [1], [0, 0, 1, 1], [], []>} : vector<64x8xf32>, vector<8x64xf32>, vector<64x64xf32> -> vector<64x64xf32>
    %cst_28 = arith.constant dense<0xFF800000> : vector<64xf32>
    %24 = vector.multi_reduction <maximumf>, %23, %cst_28 [1] : vector<64x64xf32> to vector<64xf32>
    %25 = vector.shape_cast %24 : vector<64xf32> to vector<64x1xf32>
    %26 = vector.broadcast %25 : vector<64x1xf32> to vector<64x64xf32>
    %27 = arith.subf %23, %26 : vector<64x64xf32>
    %28 = math.exp %27 : vector<64x64xf32>
    %cst_29 = arith.constant dense<0.000000e+00> : vector<64xf32>
    %29 = vector.multi_reduction <add>, %28, %cst_29 [1] : vector<64x64xf32> to vector<64xf32>
    %30 = vector.shape_cast %29 : vector<64xf32> to vector<64x1xf32>
    %31 = tpu.reciprocal %30 : vector<64x1xf32> -> vector<64x1xf32>
    %32 = arith.index_cast %19 : i32 to index
    %c0_30 = arith.constant 0 : index
    %33 = vector.load %arg11[%32, %c0_30] : memref<64x32xf32, #tpu.memory_space<vmem>>, vector<64x32xf32>
    %34 = vector.broadcast %31 : vector<64x1xf32> to vector<64x32xf32>
    %35 = arith.mulf %33, %34 : vector<64x32xf32>
    %c0_31 = arith.constant 0 : index
    %c0_32 = arith.constant 0 : index
    %36 = vector.load %arg12[%c0_31, %c0_32] : memref<32x64xf32, #tpu.memory_space<vmem>>, vector<32x64xf32>
    %cst_33 = arith.constant dense<0.000000e+00> : vector<32x64xf32>
    %37 = tpu.matmul %35, %28, %cst_33 {dimension_numbers = #tpu.dot_dimension_numbers<[0], [0], [1], [1], [0, 1, 1, 1], [], []>} : vector<64x32xf32>, vector<64x64xf32>, vector<32x64xf32> -> vector<32x64xf32>
    %38 = arith.addf %36, %37 : vector<32x64xf32>
    %c0_34 = arith.constant 0 : index
    %c0_35 = arith.constant 0 : index
    %39 = vector.load %arg12[%c0_34, %c0_35] : memref<32x64xf32, #tpu.memory_space<vmem>>, vector<32x64xf32>
    tpu.vector_store %arg12[%c0_34, %c0_35], %38 {strides = array<i32>} : memref<32x64xf32, #tpu.memory_space<vmem>>, vector<32x64xf32>,
    %c0_36 = arith.constant 0 : index
    %c0_37 = arith.constant 0 : index
    %40 = vector.load %arg13[%c0_36, %c0_37] : memref<1x64xf32, #tpu.memory_space<vmem>>, vector<1x64xf32>
    %cst_38 = arith.constant dense<0.000000e+00> : vector<1x64xf32>
    %41 = tpu.matmul %31, %28, %cst_38 {dimension_numbers = #tpu.dot_dimension_numbers<[0], [0], [1], [1], [0, 1, 1, 1], [], []>} : vector<64x1xf32>, vector<64x64xf32>, vector<1x64xf32> -> vector<1x64xf32>
    %42 = arith.addf %40, %41 : vector<1x64xf32>
    %c0_39 = arith.constant 0 : index
    %c0_40 = arith.constant 0 : index
    %43 = vector.load %arg13[%c0_39, %c0_40] : memref<1x64xf32, #tpu.memory_space<vmem>>, vector<1x64xf32>
    tpu.vector_store %arg13[%c0_39, %c0_40], %42 {strides = array<i32>} : memref<1x64xf32, #tpu.memory_space<vmem>>, vector<1x64xf32>,
    %c1_i32 = arith.constant 1 : i32
    %c0_41 = arith.constant 0 : index
    %c0_42 = arith.constant 0 : index
    %44 = vector.load %arg13[%c0_41, %c0_42] : memref<1x64xf32, #tpu.memory_space<vmem>>, vector<1x64xf32>
    %cst_43 = arith.constant 9.99999971E-10 : f32
    %45 = vector.broadcast %cst_43 : f32 to vector<1x64xf32>
    %46 = arith.addf %45, %44 : vector<1x64xf32>
    %47 = tpu.reciprocal %46 : vector<1x64xf32> -> vector<1x64xf32>
    %c0_44 = arith.constant 0 : index
    %c0_45 = arith.constant 0 : index
    %48 = vector.load %arg12[%c0_44, %c0_45] : memref<32x64xf32, #tpu.memory_space<vmem>>, vector<32x64xf32>
    %49 = vector.broadcast %47 : vector<1x64xf32> to vector<32x64xf32>
    %50 = arith.mulf %48, %49 : vector<32x64xf32>
    %c0_46 = arith.constant 0 : index
    %c0_47 = arith.constant 0 : index
    %c0_48 = arith.constant 0 : index
    %51 = vector.load %arg1[%c0_46, %c0_47, %c0_48] : memref<1x32x64xf32, #tpu.memory_space<vmem>>, vector<1x32x64xf32>
    %52 = vector.shape_cast %51 : vector<1x32x64xf32> to vector<32x64xf32>
    %53 = arith.subf %52, %50 : vector<32x64xf32>
    %c0_49 = arith.constant 0 : index
    %c0_50 = arith.constant 0 : index
    %54 = vector.load %arg5[%c0_49, %c0_50] : memref<32x32xf32, #tpu.memory_space<vmem>>, vector<32x32xf32>
    %cst_51 = arith.constant dense<0.000000e+00> : vector<32x64xf32>
    %55 = tpu.matmul %54, %53, %cst_51 {dimension_numbers = #tpu.dot_dimension_numbers<[1], [0], [0], [1], [0, 0, 1, 1], [], []>} : vector<32x32xf32>, vector<32x64xf32>, vector<32x64xf32> -> vector<32x64xf32>
    %c0_52 = arith.constant 0 : index
    %c0_53 = arith.constant 0 : index
    %56 = vector.load %arg6[%c0_52, %c0_53] : memref<32x1xf32, #tpu.memory_space<vmem>>, vector<32x1xf32>
    %57 = vector.broadcast %56 : vector<32x1xf32> to vector<32x64xf32>
    %58 = arith.addf %55, %57 : vector<32x64xf32>
    %c0_54 = arith.constant 0 : index
    %c0_55 = arith.constant 0 : index
    %c0_56 = arith.constant 0 : index
    %59 = vector.load %arg7[%c0_54, %c0_55, %c0_56] : memref<1x32x64xf32, #tpu.memory_space<vmem>>, vector<1x32x64xf32>
    %60 = vector.shape_cast %59 : vector<1x32x64xf32> to vector<32x64xf32>
    %61 = vector.shape_cast %58 : vector<32x64xf32> to vector<1x32x64xf32>
    tpu.vector_store %arg7[%c0_54, %c0_55, %c0_56], %61 {strides = array<i32>} : memref<1x32x64xf32, #tpu.memory_space<vmem>>, vector<1x32x64xf32>,
    %cst_57 = arith.constant dense<0.000000e+00> : vector<32xf32>
    %62 = vector.multi_reduction <add>, %58, %cst_57 [1] : vector<32x64xf32> to vector<32xf32>
    %63 = vector.shape_cast %62 : vector<32xf32> to vector<32x1xf32>
    %64 = arith.mulf %58, %58 : vector<32x64xf32>
    %cst_58 = arith.constant dense<0.000000e+00> : vector<32xf32>
    %65 = vector.multi_reduction <add>, %64, %cst_58 [1] : vector<32x64xf32> to vector<32xf32>
    %66 = vector.shape_cast %65 : vector<32xf32> to vector<32x1xf32>
    %67 = tpu.concatenate %63, %66 in 1 : vector<32x1xf32>, vector<32x1xf32> -> vector<32x2xf32>
    %68 = tpu.iota {dimensions = array<i32: 0>} : vector<32x32xi32>
    %69 = tpu.iota {dimensions = array<i32: 1>} : vector<32x32xi32>
    %c0_i32_59 = arith.constant 0 : i32
    %70 = vector.broadcast %c0_i32_59 : i32 to vector<32x32xi32>
    %71 = arith.addi %68, %70 : vector<32x32xi32>
    %72 = arith.cmpi eq, %71, %69 : vector<32x32xi32>
    %73 = arith.extui %72 : vector<32x32xi1> to vector<32x32xi32>
    %74 = arith.sitofp %73 : vector<32x32xi32> to vector<32x32xf32>
    %cst_60 = arith.constant dense<0.000000e+00> : vector<2x32xf32>
    %75 = tpu.matmul %67, %74, %cst_60 {dimension_numbers = #tpu.dot_dimension_numbers<[0], [0], [1], [1], [0, 1, 1, 1], [], []>} : vector<32x2xf32>, vector<32x32xf32>, vector<2x32xf32> -> vector<2x32xf32>
    %c0_61 = arith.constant 0 : index
    %c0_62 = arith.constant 0 : index
    %c0_63 = arith.constant 0 : index
    %76 = vector.load %arg8[%c0_61, %c0_62, %c0_63] : memref<1x2x32xf32, #tpu.memory_space<vmem>>, vector<1x2x32xf32>
    %77 = vector.shape_cast %76 : vector<1x2x32xf32> to vector<2x32xf32>
    %78 = vector.shape_cast %75 : vector<2x32xf32> to vector<1x2x32xf32>
    tpu.vector_store %arg8[%c0_61, %c0_62, %c0_63], %78 {strides = array<i32>} : memref<1x2x32xf32, #tpu.memory_space<vmem>>, vector<1x2x32xf32>,
    return
  }
  func.func @transform_0(%arg0: i32) -> (i32, i32, i32) {
    %c0_i32 = arith.constant 0 : i32
    %c0_i32_0 = arith.constant 0 : i32
    %c0_i32_1 = arith.constant 0 : i32
    return %arg0, %c0_i32, %c0_i32_0 : i32, i32, i32
  }
  func.func @transform_1(%arg0: i32) -> (i32, i32) {
    %c0_i32 = arith.constant 0 : i32
    %c0_i32_0 = arith.constant 0 : i32
    %c0_i32_1 = arith.constant 0 : i32
    return %c0_i32, %c0_i32_0 : i32, i32
  }
  func.func @transform_2(%arg0: i32) -> (i32, i32) {
    %c0_i32 = arith.constant 0 : i32
    %c0_i32_0 = arith.constant 0 : i32
    %c0_i32_1 = arith.constant 0 : i32
    return %c0_i32, %c0_i32_0 : i32, i32
  }
  func.func @transform_3(%arg0: i32) -> (i32, i32) {
    %c0_i32 = arith.constant 0 : i32
    %c0_i32_0 = arith.constant 0 : i32
    %c0_i32_1 = arith.constant 0 : i32
    return %c0_i32, %c0_i32_0 : i32, i32
  }
  func.func @transform_4(%arg0: i32) -> (i32, i32) {
    %c0_i32 = arith.constant 0 : i32
    %c0_i32_0 = arith.constant 0 : i32
    %c0_i32_1 = arith.constant 0 : i32
    return %c0_i32, %c0_i32_0 : i32, i32
  }
  func.func @transform_5(%arg0: i32) -> (i32, i32) {
    %c0_i32 = arith.constant 0 : i32
    %c0_i32_0 = arith.constant 0 : i32
    %c0_i32_1 = arith.constant 0 : i32
    return %c0_i32, %c0_i32_0 : i32, i32
  }
  func.func @transform_6(%arg0: i32) -> (i32, i32, i32) {
    %c0_i32 = arith.constant 0 : i32
    %c0_i32_0 = arith.constant 0 : i32
    %c0_i32_1 = arith.constant 0 : i32
    return %arg0, %c0_i32, %c0_i32_0 : i32, i32, i32
  }
  func.func @transform_7(%arg0: i32) -> (i32, i32, i32) {
    %c0_i32 = arith.constant 0 : i32
    %c0_i32_0 = arith.constant 0 : i32
    %c0_i32_1 = arith.constant 0 : i32
    return %arg0, %c0_i32, %c0_i32_0 : i32, i32, i32
  }
}

module attributes {stable_mosaic.version = 11 : i64} {
  func.func @_bn_relu_res_kernel(%arg0: i32, %arg1: i32, %arg2: memref<1x32x64xf32, #tpu.memory_space<vmem>>, %arg3: memref<1x32x64xf32, #tpu.memory_space<vmem>>, %arg4: memref<32x1xf32, #tpu.memory_space<vmem>>, %arg5: memref<32x1xf32, #tpu.memory_space<vmem>>, %arg6: memref<1x32x64xf32, #tpu.memory_space<vmem>>) attributes {dimension_semantics = [#tpu.dimension_semantics<parallel>, #tpu.dimension_semantics<parallel>], iteration_bounds = array<i64: 2, 1>, scalar_prefetch = 0 : i64, scratch_operands = 0 : i64, tpu.core_type = #tpu.core_type<tc>, window_params = [{transform_indices = @transform_0, window_bounds = array<i64: 1, 32, 64>}, {transform_indices = @transform_1, window_bounds = array<i64: 1, 32, 64>}, {pipeline_mode = #tpu.pipeline_mode<synchronous>, transform_indices = @transform_2, window_bounds = array<i64: 32, 1>}, {pipeline_mode = #tpu.pipeline_mode<synchronous>, transform_indices = @transform_3, window_bounds = array<i64: 32, 1>}, {transform_indices = @transform_4, window_bounds = array<i64: 1, 32, 64>}]} {
    %c0 = arith.constant 0 : index
    %c0_0 = arith.constant 0 : index
    %c0_1 = arith.constant 0 : index
    %0 = vector.load %arg3[%c0, %c0_0, %c0_1] : memref<1x32x64xf32, #tpu.memory_space<vmem>>, vector<1x32x64xf32>
    %c0_2 = arith.constant 0 : index
    %c0_3 = arith.constant 0 : index
    %1 = vector.load %arg4[%c0_2, %c0_3] : memref<32x1xf32, #tpu.memory_space<vmem>>, vector<32x1xf32>
    %2 = vector.shape_cast %1 : vector<32x1xf32> to vector<1x32x1xf32>
    %3 = vector.broadcast %2 : vector<1x32x1xf32> to vector<1x32x64xf32>
    %4 = arith.mulf %0, %3 : vector<1x32x64xf32>
    %c0_4 = arith.constant 0 : index
    %c0_5 = arith.constant 0 : index
    %5 = vector.load %arg5[%c0_4, %c0_5] : memref<32x1xf32, #tpu.memory_space<vmem>>, vector<32x1xf32>
    %6 = vector.shape_cast %5 : vector<32x1xf32> to vector<1x32x1xf32>
    %7 = vector.broadcast %6 : vector<1x32x1xf32> to vector<1x32x64xf32>
    %8 = arith.addf %4, %7 : vector<1x32x64xf32>
    %c0_6 = arith.constant 0 : index
    %c0_7 = arith.constant 0 : index
    %c0_8 = arith.constant 0 : index
    %9 = vector.load %arg2[%c0_6, %c0_7, %c0_8] : memref<1x32x64xf32, #tpu.memory_space<vmem>>, vector<1x32x64xf32>
    %cst = arith.constant 0.000000e+00 : f32
    %10 = vector.broadcast %cst : f32 to vector<1x32x64xf32>
    %11 = arith.maximumf %8, %10 : vector<1x32x64xf32>
    %12 = arith.addf %9, %11 : vector<1x32x64xf32>
    %c0_9 = arith.constant 0 : index
    %c0_10 = arith.constant 0 : index
    %c0_11 = arith.constant 0 : index
    %13 = vector.load %arg6[%c0_9, %c0_10, %c0_11] : memref<1x32x64xf32, #tpu.memory_space<vmem>>, vector<1x32x64xf32>
    tpu.vector_store %arg6[%c0_9, %c0_10, %c0_11], %12 {strides = array<i32>} : memref<1x32x64xf32, #tpu.memory_space<vmem>>, vector<1x32x64xf32>,
    return
  }
  func.func @transform_0(%arg0: i32, %arg1: i32) -> (i32, i32, i32) {
    %c0_i32 = arith.constant 0 : i32
    %c0_i32_0 = arith.constant 0 : i32
    return %arg0, %c0_i32, %arg1 : i32, i32, i32
  }
  func.func @transform_1(%arg0: i32, %arg1: i32) -> (i32, i32, i32) {
    %c0_i32 = arith.constant 0 : i32
    %c0_i32_0 = arith.constant 0 : i32
    return %arg0, %c0_i32, %arg1 : i32, i32, i32
  }
  func.func @transform_2(%arg0: i32, %arg1: i32) -> (i32, i32) {
    %c0_i32 = arith.constant 0 : i32
    %c0_i32_0 = arith.constant 0 : i32
    %c0_i32_1 = arith.constant 0 : i32
    return %c0_i32, %c0_i32_0 : i32, i32
  }
  func.func @transform_3(%arg0: i32, %arg1: i32) -> (i32, i32) {
    %c0_i32 = arith.constant 0 : i32
    %c0_i32_0 = arith.constant 0 : i32
    %c0_i32_1 = arith.constant 0 : i32
    return %c0_i32, %c0_i32_0 : i32, i32
  }
  func.func @transform_4(%arg0: i32, %arg1: i32) -> (i32, i32, i32) {
    %c0_i32 = arith.constant 0 : i32
    %c0_i32_0 = arith.constant 0 : i32
    return %arg0, %c0_i32, %arg1 : i32, i32, i32
  }
}

</mosaic_0001>

<bundles_post_ra>
// kernel: _transformer_layer_impl.3
= control target key start
LH: loop header
LB: loop body
LE: loop exit
PB: predicated region body
PF: predicated region fallthrough
CT: control target
= control target key end

     0   :  { %9 = vsyncpa [#allocation3], 0  ;;  %s777_s0 = inlined_call_operand.vmem [shape: f32[2,32,64], index: 0, kind: input, shape index: {}]   ;;  %s778_s1 = inlined_call_operand.vmem [shape: f32[2,32,64], index: 1, kind: input, shape index: {}]   ;;  %s779_s2 = inlined_call_operand.vmem [shape: f32[32,1], index: 2, kind: input, shape index: {}]   ;;  %s780_s3 = inlined_call_operand.vmem [shape: f32[32,1], index: 3, kind: input, shape index: {}]   ;;  %s781_s4 = inlined_call_operand.hbm [shape: f32[2,32,64], index: 4, kind: output, shape index: {}]  }
   0x1   :  { %11 = vsyncpa [#allocation3 + $0x1], 0  ;;  %s627_s15 = smov 0   ;;  %s629_s16 = smov 0  }
   0x2   :  { %s631_s17 = smov 0   ;;  %s633_s18 = smov 0  }
   0x3   :  { %s635_s19 = smov 0   ;;  %s637_s20 = smov 0  }
   0x4 LB: > { %s440_s21 = sadd.s32 4294967295, %s596_s20   ;;  %s441_s22 = sadd.s32 4294967294, %s596_s20   ;;  %s596_s20 = sphi %s637_s20, %s17_s20   ;;  %s592_s19 = sphi %s635_s19, %s788_s19   ;;  %s588_s18 = sphi %s633_s18, %s787_s18   ;;  %s584_s17 = sphi %s631_s17, %s786_s17   ;;  %s580_s16 = sphi %s629_s16, %s785_s16   ;;  %s576_s15 = sphi %s627_s15, %s784_s15  }
   0x5   : > { %s29_s23 = sadd.s32 1, %s592_s19  ;;  %s136_s24 = sadd.s32 1, %s584_s17 }
   0x6   : > { %p31_p0 = scmp.ge.s32.totalorder %s29_s23, 2  ;;  %p146_p1 = scmp.ne.s32.totalorder %s584_s17, %s580_s16 }
   0x7   : > { %p147_p2 = scmp.eq.s32.totalorder %s440_s21, 1  ;;  %p152_p3 = scmp.ne.s32.totalorder %s580_s16, %s576_s15 }
   0x8   : > { %s790_s23 = smov (%p31_p0, %s29_s23), 0  ;;  %p153_p5 = scmp.eq.s32.totalorder %s441_s22, 1 }
   0x9   : > { %p667_p4 = por %p147_p2, %p146_p1  ;;  %s131_s26 = ssub.s32 %s592_s19, %s790_s23 }
   0xa   : > { %p444_p6 = scmp.ge.s32.totalorder %s596_s20, 1  ;;  %p134_p7 = scmp.eq.s32.totalorder %s131_s26, 0 }
   0xb   : > { %p674_p8 = por %p153_p5, %p152_p3  ;;  %p199_p9 = scmp.lt.s32.totalorder %s596_s20, 3 }
   0xc   : > { %s680_s28 = scalar_select %p134_p7, %s584_s17, %s136_s24  }
   0xd   : > { %p200_p10 = pnand %p444_p6, %p199_p9 }
   0xe   : > { %v258_v0 = vld [vmem:[%s779_s2 + $0x10] sm:$0xff] (!%p200_p10)  ;;  %v256_v1 = vld [vmem:[%s779_s2] sm:$0xff] (!%p200_p10)  ;;  %v598_v2 = vmov (!%p200_p10), 0   ;;  %v259_v3 = vld [vmem:[%s779_s2 + $0x18] sm:$0xff] (!%p200_p10)  ;;  %p236_p11 = scmp.lt.s32.totalorder (!%p200_p10), %s588_s18, 1  ;;  %s233_s8 = sand.u32 (!%p200_p10), 1, %s580_s16  }
   0xf   : > { %203 = sbr.rel (%p200_p10) target bundleno = 177 (0xb1), region = 36  ;;  %517 = vset.pattern.permute.xlu1 (!%p200_p10), %v598_v2  ;;  %516 = vset.pattern.permute.xlu0 (!%p200_p10), %v598_v2  ;;  %v257_v4 = vld [vmem:[%s779_s2 + $0x8] sm:$0xff] (!%p200_p10)  ;;  %v284_v6 = vld [vmem:[%s780_s3] sm:$0xff] (!%p200_p10)  ;;  %v287_v7 = vld [vmem:[%s780_s3 + $0x18] sm:$0xff] (!%p200_p10)  ;;  %s445_s12 = sshll.u32 (!%p200_p10), %s233_s8, 5  ;;  %vm324_vm0 = vcmask (!%p200_p10), 523264  }
  0x10   : > { %272 = vperm.xlu1 (!%p200_p10), %517, %v258_v0   ;;  %262 = vperm.xlu0 (!%p200_p10), %516, %v256_v1   ;;  %v285_v5 = vld [vmem:[%s780_s3 + $0x8] sm:$0xff] (!%p200_p10)  ;;  %v286_v8 = vld [vmem:[%s780_s3 + $0x10] sm:$0xff] (!%p200_p10)  ;;  %s457_s13 = sshll.u32 (!%p200_p10), %s588_s18, 9  ;;  %s235_s14 = scalar_lea.vmem (!%p200_p10), [#allocation2], %s445_s12 }
  0x11   : > { %s344_s21 = sshll.u32 (!%p200_p10), %s235_s14, 4  ;;  %s723_s26 = scalar_lea.hbm (!%p200_p10), %s781_s4, %s457_s13  ;;  %s725_s21 = int_to_ptr.vmem [resolvable:$true] %s344_s21 }
  0x14   : > { %277 = vperm.xlu1 (!%p200_p10), %517, %v259_v3   ;;  %267 = vperm.xlu0 (!%p200_p10), %516, %v257_v4  }
  0x16   : > { %s237_s29 = scalar_select %p236_p11, %s588_s18, 1 }
  0x17   : > { %s731_s18 = scalar_lea.sflag [#allocation3], %s233_s8 }
  0x18   : > { %295 = vperm.xlu1 %517, %v285_v5   ;;  %290 = vperm.xlu0 %516, %v284_v6   ;;  %s455_s30 = sshll.u32 %s237_s29, 5  ;;  %s518_s29 = scalar_lea.vmem %s725_s21, 512 }
  0x19   : > { %s251_s7 = scalar_lea.vmem %s778_s1, %s455_s30  ;;  %s243_s11 = scalar_lea.vmem %s777_s0, %s455_s30 }
  0x1a   : > { %v252_v11 = vld [vmem:[%s251_s7] sm:$0xff]  ;;  %v253_v14 = vld [vmem:[%s251_s7 + $0x8] sm:$0xff]  ;;  %v254_v17 = vld [vmem:[%s251_s7 + $0x10] sm:$0xff]  ;;  %p519_p12 = scmp.ne.s32.totalorder %s725_s21, %s518_s29  ;;  %s599_s30 = smov [#allocation2]  }
  0x1b   : > { %v255_v18 = vld [vmem:[%s251_s7 + $0x18] sm:$0xff]  ;;  %v313_v23 = vld [vmem:[%s243_s11 + $0x8] sm:$0xff]  ;;  %v312_v24 = vld [vmem:[%s243_s11] sm:$0xff]  ;;  %s522_s5 = sshll.u32 %s599_s30, 4  ;;  %s523_s5 = int_to_ptr.vmem [resolvable:$false] %s522_s5 }
  0x1c   : > { %305 = vperm.xlu1 %517, %v287_v7   ;;  %300 = vperm.xlu0 %516, %v286_v8   ;;  %v315_v35 = vld [vmem:[%s243_s11 + $0x18] sm:$0xff]  ;;  %v314_v36 = vld [vmem:[%s243_s11 + $0x10] sm:$0xff]  ;;  %p520_p13 = pnand %p519_p12, %p667_p4  ;;  %s524_s6 = scalar_lea.vmem %s523_s5, 1024 }
  0x1d   : > { %p525_p1 = scmp.lt.s32.totalorder %s725_s21, %s523_s5  ;;  %p526_p2 = scmp.lt.s32.totalorder %s524_s6, %s518_s29 }
  0x1e   : > { %p521_p0 = pneg %p520_p13 }
  0x1f   : > { %p527_p3 = por %p526_p2, %p525_p1 }
  0x21   : > { %p528_p5 = pnand %p527_p3, %p521_p0 }
  0x8f   : > { %v273_v9 = vpop.permute.xlu1 %272  ;;  %v263_v10 = vpop.permute.xlu0 %262 }
  0x90   : > { %v280_v15 = vmul.f32 %v263_v10, %v252_v11  ;;  %v282_v25 = vmul.f32 %v273_v9, %v254_v17 }
  0x93   : > { %v278_v12 = vpop.permute.xlu1 %277  ;;  %v268_v13 = vpop.permute.xlu0 %267 }
  0x94   : > { %v281_v16 = vmul.f32 %v268_v13, %v253_v14  ;;  %v283_v26 = vmul.f32 %v278_v12, %v255_v18 }
  0x97   : > { %v296_v19 = vpop.permute.xlu1 %295  ;;  %v291_v20 = vpop.permute.xlu0 %290 }
  0x98   : > { %v309_v21 = vadd.f32 %v296_v19, %v281_v16  ;;  %v308_v22 = vadd.f32 %v291_v20, %v280_v15 }
  0x9a   : > { %v317_v27 = vmax.f32 %v309_v21, 0.0  ;;  %v316_v28 = vmax.f32 %v308_v22, 0.0 }
  0x9b   : > { %v306_v29 = vpop.permute.xlu1 %305  ;;  %v301_v30 = vpop.permute.xlu0 %300 }
  0x9c   : > { %v321_v31 = vadd.f32 %v317_v27, %v313_v23  ;;  %v320_v32 = vadd.f32 %v316_v28, %v312_v24  ;;  %v311_v33 = vadd.f32 %v306_v29, %v283_v26  ;;  %v310_v34 = vadd.f32 %v301_v30, %v282_v25 }
  0x9e   : > { %326 = vst.msk [vmem:[%s235_s14 + $0x8] sm:$0xff] %vm324_vm0, %v321_v31  ;;  %325 = vst.msk [vmem:[%s235_s14] sm:$0xff] %vm324_vm0, %v320_v32  ;;  %v319_v37 = vmax.f32 %v311_v33, 0.0  ;;  %v318_v38 = vmax.f32 %v310_v34, 0.0 }
  0xa0   : > { %v323_v39 = vadd.f32 %v319_v37, %v315_v35  ;;  %v322_v40 = vadd.f32 %v318_v38, %v314_v36 }
  0xa2   : > { %328 = vst.msk [vmem:[%s235_s14 + $0x18] sm:$0xff] %vm324_vm0, %v323_v39  ;;  %327 = vst.msk [vmem:[%s235_s14 + $0x10] sm:$0xff] %vm324_vm0, %v322_v40 }
  0xa3   : > { %531 = shalt.err (!%p528_p5)
}
  0xa4   : > { %s532_s7 = scalar_lea.hbm %s723_s26, 512  ;;  %s536_s10 = scalar_lea.hbm %s781_s4, 1024 }
  0xa5   : > { %p533_p6 = scmp.ne.s32.totalorder %s723_s26, %s532_s7  ;;  %p537_p10 = scmp.lt.u32.totalorder %s723_s26, %s781_s4 }
  0xa6   : > { %p538_p11 = scmp.lt.u32.totalorder %s536_s10, %s532_s7  ;;  %p540_p13 = scmp.lt.u32.totalorder %s532_s7, %s723_s26 }
  0xa7   : > { %p534_p7 = pnand %p533_p6, %p667_p4 }
  0xa8   : > { %p539_p12 = por %p538_p11, %p537_p10 }
  0xa9   : > { %p535_p9 = pneg %p534_p7 }
  0xaa   : > { %p541_p0 = por %p540_p13, %p539_p12 }
  0xac   : > { %p542_p1 = pnand %p541_p0, %p535_p9 }
  0xae   : > { %545 = shalt.err (!%p542_p1)
}
  0xaf   : > { %s600_s13 = smov 128   ;;  %s601_s14 = smov 8  }
  0xb0   : > { %458 = dma.vmem_to_hbm [thread:$0]  (%p667_p4), %s725_s21, 512, %s723_s26, %s731_s18, %s600_s13, %s600_s13, %s601_s14  }
  0xb1 PF: > { %p464_p2 = scmp.ge.s32.totalorder %s596_s20, 2  ;;  %s359_s22 = sand.u32 1, %s576_s15  }
  0xb2   : > { %s360_s24 = scalar_lea.sflag [#allocation3], %s359_s22 }
  0xb3   : > { %p461_p3 = pnand %p464_p2, %p674_p8 }
  0xb5   : > { %571 = dma.done.wait (!%p461_p3), %s360_s24, 512  }
  0xb6   : > { %573 = vsyncadd (!%p461_p3), %s360_s24, 4294966784  ;;  %s17_s20 = sadd.s32 1, %s596_s20   ;;  %s784_s15 = smov %s580_s16 }
  0xb7   : > { %p14_p5 = scmp.ge.s32.totalorder %s17_s20, 4   ;;  %s785_s16 = smov %s584_s17 }
  0xb8   : > { %s786_s17 = smov %s680_s28  ;;  %s787_s18 = smov %s592_s19 }
  0xb9   : > { %s788_s19 = smov %s790_s23  ;;  %16 = sbr.rel (!%p14_p5) target bundleno = 4 (0x4), region = 74 }
  0xc0   :  { %365 = vsyncpa [#allocation3], 1 }
  0xc1   :  { %367 = vsyncpa [#allocation3 + $0x1], 1 }

// kernel: _transformer_layer_impl.2
= control target key start
LH: loop header
LB: loop body
LE: loop exit
PB: predicated region body
PF: predicated region fallthrough
CT: control target
= control target key end

     0   :  { %s2019_s24 = smov 0   ;;  %s2236_s0 = inlined_call_operand.vmem [shape: f32[2,32,64], index: 0, kind: input, shape index: {}]   ;;  %s2237_s1 = inlined_call_operand.vmem [shape: f32[32,8], index: 1, kind: input, shape index: {}]   ;;  %s2238_s2 = inlined_call_operand.vmem [shape: f32[32,32], index: 2, kind: input, shape index: {}]   ;;  %s2239_s3 = inlined_call_operand.vmem [shape: f32[1,32], index: 3, kind: input, shape index: {}]   ;;  %s2240_s4 = inlined_call_operand.vmem [shape: f32[32,32], index: 4, kind: input, shape index: {}]   ;;  %s2241_s5 = inlined_call_operand.vmem [shape: f32[32,1], index: 5, kind: input, shape index: {}]   ;;  %s2242_s6 = inlined_call_operand.vmem [shape: f32[2,32,64], index: 6, kind: output, shape index: {0}]   ;;  %s2243_s7 = inlined_call_operand.vmem [shape: f32[2,2,32], index: 7, kind: output, shape index: {1}]  }
   0x1 LB: > { %s1592_s25 = sadd.s32 4294967295, %s1972_s24   ;;  %p1596_p0 = scmp.ge.s32.totalorder %s1972_s24, 1  ;;  %s1972_s24 = sphi %s2019_s24, %s18_s24  }
   0x2   : > { %p240_p1 = scmp.lt.s32.totalorder %s1972_s24, 3 }
   0x4   : > { %p241_p2 = pnand %p1596_p0, %p240_p1 }
   0x5   : > { %v294_v0 = vld [vmem:[%s2237_s1] sm:$0xff] (!%p241_p2)  ;;  %p276_p3 = scmp.lt.s32.totalorder (!%p241_p2), %s1592_s25, 1  ;;  %v295_v1 = vld [vmem:[%s2237_s1 + $0x8] sm:$0xff] (!%p241_p2)  ;;  %v1974_v2 = vmov (!%p241_p2), 0.0|0.0   ;;  %vm1975_vm0 = vmmov (!%p241_p2), 0   ;;  %v1976_v3 = vmov (!%p241_p2), 0.0  }
   0x6   : > { %244 = sbr.rel (%p241_p2) target bundleno = 1984 (0x7c0), region = 44  ;;  %298 = vxpose.xlu1.b32.start [1/4] (short) (narrow) (!%p241_p2), %v294_v0, 8  ;;  %1853 = vmatprep.subr.bf16.mxu0 (!%p241_p2), %v1974_v2  ;;  %v1859_v4 = vpack.c.bf16 (!%p241_p2), %v295_v1, %v294_v0  ;;  %v296_v5 = vld [vmem:[%s2237_s1 + $0x10] sm:$0xff] (!%p241_p2)  ;;  %v297_v6 = vld [vmem:[%s2237_s1 + $0x18] sm:$0xff] (!%p241_p2)  ;;  %v580_v11 = vld [vmem:[%s2238_s2] sm:$0xff] (!%p241_p2)  ;;  %vm330_vm1 = vcmask (!%p241_p2), 261120  }
   0x7   : > { %1730 = vmatprep.mubr.msk.f32.mxu0 (!%p241_p2), %vm1975_vm0, %v1976_v3  ;;  %v1863_v9 = vpack.c.bf16 (!%p241_p2), %v297_v6, %v296_v5  ;;  %v581_v12 = vld [vmem:[%s2238_s2 + $0x8] sm:$0xff] (!%p241_p2)  ;;  %v582_v17 = vld [vmem:[%s2238_s2 + $0x10] sm:$0xff] (!%p241_p2)  ;;  %v583_v18 = vld [vmem:[%s2238_s2 + $0x18] sm:$0xff] (!%p241_p2)  ;;  %vm404_vm2 = vcmask (!%p241_p2), 523264   ;;  %vm571_vm3 = vcmask (!%p241_p2), 64512   ;;  %vm708_vm4 = vcmask (!%p241_p2), 516096  }
   0x8   : > { %1860 = vmatprep.subr.bf16.mxu1 (!%p241_p2), %v1859_v4  ;;  %v1867_v16 = vpack.c.bf16 (!%p241_p2), %v581_v12, %v580_v11  ;;  %v1871_v19 = vpack.c.bf16 (!%p241_p2), %v583_v18, %v582_v17  ;;  %704 = vst.msk [vmem:[#allocation5] sm:$0xff] (!%p241_p2), %vm404_vm2, %v1976_v3  ;;  %705 = vst.msk [vmem:[#allocation5 + $0x8] sm:$0xff] (!%p241_p2), %vm404_vm2, %v1976_v3  ;;  %v1611_v32 = vld [vmem:[%s2239_s3] ss:$0 sm:$0xff] (!%p241_p2)  ;;  %vm1375_vm11 = vcmask (!%p241_p2), 7168   ;;  %vm1504_vm12 = vcmask (!%p241_p2), 254976  }
   0x9   : > { %1862 = vmatpush3.bf16.msra.mxu1 (!%p241_p2), %v1859_v4  ;;  %706 = vst.msk [vmem:[#allocation5 + $0x10] sm:$0xff] (!%p241_p2), %vm404_vm2, %v1976_v3  ;;  %707 = vst.msk [vmem:[#allocation5 + $0x18] sm:$0xff] (!%p241_p2), %vm404_vm2, %v1976_v3 }
   0xa   : > { %299 = vxpose.xlu1.b32.cont [2/4] (short) (narrow) (!%p241_p2), %v295_v1, 8  ;;  %1864 = vmatprep.subr.bf16.mxu1 (!%p241_p2), %v1863_v9  ;;  %709 = vst.msk [vmem:[#allocation6] sm:$0x1] (!%p241_p2), %vm708_vm4, %v1976_v3 }
   0xd   : > { %s2245_s25 = smov (!%p276_p3, %s1592_s25), 1  ;;  %1866 = vmatpush3.bf16.msra.mxu1 %v1863_v9 }
   0xe   : > { %s1648_s30 = sshll.u32 %s2245_s25, 5  ;;  %300 = vxpose.xlu1.b32.cont [3/4] (short) (narrow) %v296_v5, 8 }
   0xf   : > { %s280_s10 = scalar_lea.vmem %s2236_s0, %s1648_s30  ;;  %s285_s23 = scalar_lea.vmem %s2242_s6, %s1648_s30 }
  0x10   : > { %v2050_v7 = vld [vmem:[%s280_s10] sm:$0xff]  ;;  %v2052_v8 = vld [vmem:[%s280_s10 + $0x8] sm:$0xff]  ;;  %v2063_v13 = vld [vmem:[%s280_s10 + $0x10] sm:$0xff]  ;;  %s1601_s30 = sshll.u32 %s2245_s25, 1 }
  0x11   : > { %410 = vxpose.xlu0.b32.start [1/4] (short) (narrow) %v2050_v7, 64  ;;  %v1854_v10 = vpack.c.bf16 %v2052_v8, %v2050_v7  ;;  %v2065_v14 = vld [vmem:[%s280_s10 + $0x18] sm:$0xff]  ;;  %s289_s28 = scalar_lea.vmem %s2243_s7, %s1601_s30 }
  0x12   : > { %v1857_v15 = vpack.c.bf16 %v2065_v14, %v2063_v13  ;;  %301 = vxpose.xlu1.b32.end [4/4] (short) (narrow) %v297_v6, 8 }
  0x13   : > { %1855 = vmatpush3.bf16.msra.mxu0 %v1854_v10 }
  0x14   : > { %1856 = vmatprep.subr.bf16.mxu0 %v1974_v2 }
  0x15   : > { %411 = vxpose.xlu0.b32.cont [2/4] (short) (narrow) %v2052_v8, 64 }
  0x17   : > { %1858 = vmatpush3.bf16.msra.mxu0 %v1857_v15 }
  0x18   : > { %1868 = vmatprep.subr.bf16.mxu0 %v1867_v16 }
  0x19   : > { %412 = vxpose.xlu0.b32.cont [3/4] (short) (narrow) %v2063_v13, 64 }
  0x1d   : > { %413 = vxpose.xlu0.b32.end [4/4] (short) (narrow) %v2065_v14, 64 }
  0x86   : > { %v314_v20 = vpop.trf.xlu1 }
  0x87   : > { %1731 = vmatmul.mubr.msk.f32.vlgmr.msra.gmra.mrb[0].mxu0 %vm330_vm1, %v314_v20 }
  0x88   : > { %1870 = vmatpush3.bf16.msra.mxu0 %v1867_v16 }
  0x89   : > { %1872 = vmatprep.subr.bf16.mxu0 %v1871_v19 }
  0x8c   : > { %1874 = vmatpush3.bf16.msra.mxu0 %v1871_v19 }
  0x91   : > { %v426_v21 = vpop.trf.xlu0 }
  0x92   : > { %1741 = vmatprep.mubr.msk.f32.mxu1 %vm330_vm1, %v426_v21  ;;  %1761 = vmatprep.mubr.msk.f32.mxu0 %vm330_vm1, %v426_v21 }
  0x95   : > { %v427_v22 = vpop.trf.xlu0 }
  0x96   : > { %1742 = vmatmul.mubr.msk.f32.vlgmr.msra.gmra.mrb[0].mxu1 %vm330_vm1, %v427_v22  ;;  %1762 = vmatmul.mubr.msk.f32.vlgmr.msra.gmra.mrb[2].mxu0 %vm330_vm1, %v427_v22 }
  0x99   : > { %v428_v23 = vpop.trf.xlu0 }
  0x9a   : > { %1744 = vmatprep.mubr.msk.f32.mxu1 %vm330_vm1, %v428_v23  ;;  %1764 = vmatprep.mubr.msk.f32.mxu0 %vm330_vm1, %v428_v23 }
  0x9d   : > { %v429_v24 = vpop.trf.xlu0 }
  0x9e   : > { %1745 = vmatmul.mubr.msk.f32.gmra.mrb[2].mxu1 %vm330_vm1, %v429_v24  ;;  %1765 = vmatmul.mubr.msk.f32.gmra.mrb[4].mxu0 %vm330_vm1, %v429_v24 }
  0xa1   : > { %v430_v25 = vpop.trf.xlu0 }
  0xa2   : > { %1747 = vmatprep.mubr.msk.f32.mxu1 %vm330_vm1, %v430_v25  ;;  %1767 = vmatprep.mubr.msk.f32.mxu0 %vm330_vm1, %v430_v25 }
  0xa5   : > { %v431_v26 = vpop.trf.xlu0 }
  0xa6   : > { %1748 = vmatmul.mubr.msk.f32.gmra.mrb[4].mxu1 %vm330_vm1, %v431_v26  ;;  %1768 = vmatmul.mubr.msk.f32.gmra.mrb[6].mxu0 %vm330_vm1, %v431_v26 }
  0xa9   : > { %v432_v27 = vpop.trf.xlu0 }
  0xaa   : > { %1750 = vmatprep.mubr.msk.f32.mxu1 %vm330_vm1, %v432_v27  ;;  %1770 = vmatprep.mubr.msk.f32.mxu0 %vm330_vm1, %v432_v27 }
  0xad   : > { %v433_v28 = vpop.trf.xlu0 }
  0xae   : > { %1751 = vmatmul.mubr.msk.f32.gmra.mrb[6].mxu1 %vm330_vm1, %v433_v28  ;;  %1771 = vmatmul.mubr.msk.f32.gmra.mrb[8].mxu0 %vm330_vm1, %v433_v28 }
 0x15a   : > { %v400_v29 = vpop.f32.mrb[0].mxu0 }
 0x15b   : > { %405 = vst.msk [vmem:[#allocation2] sm:$0xff] %vm404_vm2, %v400_v29  ;;  %v1732_v30 = vpop.f32.mrb[1].mxu0 }
 0x162   : > { %v718_v31 = vld [vmem:[#allocation2] sm:$0xff] }
 0x163   : > { %1773 = vmatprep.subr.mxu1 %v718_v31 }
 0x164   : > { %1774 = vmatpush3.msra.mxu1 %v718_v31 }
 0x165   : > { %1891 = vmatprep.subr.bf16.mxu1 %v1974_v2 }
 0x169   : > { %v1743_v33 = vpop.f32.mrb[0].mxu1  ;;  %v1763_v34 = vpop.f32.mrb[2].mxu0 }
 0x16a   : > { %573 = vst.msk [vmem:[#allocation3 + $0x8] sm:$0xff] %vm571_vm3, %v1743_v33  ;;  %v663_v35 = vadd.f32 %v1763_v34, %v1611_v32  ;;  %v532_v36 = vpop.f32.mrb[1].mxu1  ;;  %v657_v37 = vpop.f32.mrb[3].mxu0 }
 0x16b   : > { %572 = vst.msk [vmem:[#allocation3] sm:$0xff] %vm571_vm3, %v532_v36  ;;  %v658_v38 = vadd.f32 %v1611_v32, %v657_v37 }
 0x16c   : > { %697 = vst.msk [vmem:[#allocation4 + $0x8] sm:$0xff] %vm330_vm1, %v663_v35 }
 0x16d   : > { %696 = vst.msk [vmem:[#allocation4] sm:$0xff] %vm330_vm1, %v658_v38 }
 0x171   : > { %v1746_v39 = vpop.f32.mrb[2].mxu1  ;;  %v1766_v40 = vpop.f32.mrb[4].mxu0  ;;  %v711_v46 = vld [vmem:[#allocation3 + $0x8] sm:$0xff] }
 0x172   : > { %575 = vst.msk [vmem:[#allocation3 + $0x18] sm:$0xff] %vm571_vm3, %v1746_v39  ;;  %v673_v41 = vadd.f32 %v1766_v40, %v1611_v32  ;;  %v542_v42 = vpop.f32.mrb[3].mxu1  ;;  %v667_v43 = vpop.f32.mrb[5].mxu0  ;;  %v710_v44 = vld [vmem:[#allocation3] sm:$0xff] }
 0x173   : > { %574 = vst.msk [vmem:[#allocation3 + $0x10] sm:$0xff] %vm571_vm3, %v542_v42  ;;  %v668_v45 = vadd.f32 %v1611_v32, %v667_v43  ;;  %1775 = vmatprep.mubr.msk.f32.mxu1 %vm571_vm3, %v710_v44 }
 0x174   : > { %699 = vst.msk [vmem:[#allocation4 + $0x18] sm:$0xff] %vm330_vm1, %v673_v41  ;;  %1776 = vmatmul.mubr.msk.f32.vlgmr.msra.gmra.mrb[8].mxu1 %vm571_vm3, %v711_v46 }
 0x175   : > { %698 = vst.msk [vmem:[#allocation4 + $0x10] sm:$0xff] %vm330_vm1, %v668_v45 }
 0x179   : > { %v1749_v47 = vpop.f32.mrb[4].mxu1  ;;  %v1769_v48 = vpop.f32.mrb[6].mxu0  ;;  %v713_v54 = vld [vmem:[#allocation3 + $0x18] sm:$0xff] }
 0x17a   : > { %577 = vst.msk [vmem:[#allocation3 + $0x28] sm:$0xff] %vm571_vm3, %v1749_v47  ;;  %v683_v49 = vadd.f32 %v1769_v48, %v1611_v32  ;;  %v552_v50 = vpop.f32.mrb[5].mxu1  ;;  %v677_v51 = vpop.f32.mrb[7].mxu0  ;;  %v712_v52 = vld [vmem:[#allocation3 + $0x10] sm:$0xff] }
 0x17b   : > { %576 = vst.msk [vmem:[#allocation3 + $0x20] sm:$0xff] %vm571_vm3, %v552_v50  ;;  %v678_v53 = vadd.f32 %v1611_v32, %v677_v51  ;;  %1778 = vmatprep.mubr.msk.f32.mxu1 %vm571_vm3, %v712_v52 }
 0x17c   : > { %701 = vst.msk [vmem:[#allocation4 + $0x28] sm:$0xff] %vm330_vm1, %v683_v49  ;;  %1779 = vmatmul.mubr.msk.f32.gmra.mrb[10].mxu1 %vm571_vm3, %v713_v54 }
 0x17d   : > { %700 = vst.msk [vmem:[#allocation4 + $0x20] sm:$0xff] %vm330_vm1, %v678_v53 }
 0x181   : > { %v1752_v55 = vpop.f32.mrb[6].mxu1  ;;  %v1772_v56 = vpop.f32.mrb[8].mxu0  ;;  %v715_v61 = vld [vmem:[#allocation3 + $0x28] sm:$0xff] }
 0x182   : > { %579 = vst.msk [vmem:[#allocation3 + $0x38] sm:$0xff] %vm571_vm3, %v1752_v55  ;;  %v562_v57 = vpop.f32.mrb[7].mxu1  ;;  %v714_v58 = vld [vmem:[#allocation3 + $0x20] sm:$0xff]  ;;  %v693_v59 = vadd.f32 %v1772_v56, %v1611_v32  ;;  %v687_v60 = vpop.f32.mrb[9].mxu0 }
 0x183   : > { %578 = vst.msk [vmem:[#allocation3 + $0x30] sm:$0xff] %vm571_vm3, %v562_v57  ;;  %1781 = vmatprep.mubr.msk.f32.mxu1 %vm571_vm3, %v714_v58  ;;  %v688_v62 = vadd.f32 %v1611_v32, %v687_v60 }
 0x184   : > { %703 = vst.msk [vmem:[#allocation4 + $0x38] sm:$0xff] %vm330_vm1, %v693_v59  ;;  %1782 = vmatmul.mubr.msk.f32.gmra.mrb[12].mxu1 %vm571_vm3, %v715_v61 }
 0x185   : > { %702 = vst.msk [vmem:[#allocation4 + $0x30] sm:$0xff] %vm330_vm1, %v688_v62 }
 0x189   : > { %v717_v63 = vld [vmem:[#allocation3 + $0x38] sm:$0xff] }
 0x18a   : > { %v716_v0 = vld [vmem:[#allocation3 + $0x30] sm:$0xff] }
 0x18b   : > { %1784 = vmatprep.mubr.msk.f32.mxu1 %vm571_vm3, %v716_v0 }
 0x18c   : > { %1785 = vmatmul.mubr.msk.f32.gmra.mrb[14].mxu1 %vm571_vm3, %v717_v63 }
 0x18d   : > { %1825 = vmatprep.mubr.msk.f32.mxu1 %vm1975_vm0, %v1976_v3 }
 0x247   : > { %v1777_v1 = vpop.f32.mrb[8].mxu1 }
 0x248   : > { %v809_v4 = vpop.f32.mrb[9].mxu1  ;;  %v851_v5 = vsel %vm404_vm2, %v1777_v1, -inf }
 0x249   : > { %852 = vmax.xlane.f32.xlu1 %v851_v5  ;;  %v848_v6 = vsel %vm404_vm2, %v809_v4, -inf }
 0x24a   : > { %849 = vmax.xlane.f32.xlu0 %v848_v6 }
 0x24f   : > { %v1780_v9 = vpop.f32.mrb[10].mxu1 }
 0x250   : > { %v819_v10 = vpop.f32.mrb[11].mxu1  ;;  %v857_v11 = vsel %vm404_vm2, %v1780_v9, -inf }
 0x251   : > { %858 = vmax.xlane.f32.xlu1 %v857_v11  ;;  %v854_v12 = vsel %vm404_vm2, %v819_v10, -inf }
 0x255   : > { %855 = vmax.xlane.f32.xlu1 %v854_v12  ;;  %v928_v12 = vld [vmem:[#allocation4] sm:$0xff] }
 0x257   : > { %v1783_v15 = vpop.f32.mrb[12].mxu1 }
 0x258   : > { %v829_v16 = vpop.f32.mrb[13].mxu1  ;;  %v863_v17 = vsel %vm404_vm2, %v1783_v15, -inf }
 0x259   : > { %864 = vmax.xlane.f32.xlu1 %v863_v17  ;;  %v860_v18 = vsel %vm404_vm2, %v829_v16, -inf  ;;  %v929_v17 = vld [vmem:[#allocation4 + $0x8] sm:$0xff] }
 0x25d   : > { %861 = vmax.xlane.f32.xlu1 %v860_v18 }
 0x25f   : > { %v1786_v19 = vpop.f32.mrb[14].mxu1 }
 0x260   : > { %v839_v20 = vpop.f32.mrb[15].mxu1  ;;  %v869_v22 = vsel %vm404_vm2, %v1786_v19, -inf }
 0x261   : > { %v866_v21 = vsel %vm404_vm2, %v839_v20, -inf }
 0x262   : > { %867 = vmax.xlane.f32.xlu1 %v866_v21 }
 0x266   : > { %870 = vmax.xlane.f32.xlu1 %v869_v22  ;;  %v930_v22 = vld [vmem:[#allocation4 + $0x10] sm:$0xff] }
 0x2d6   : > { %v853_v23 = vpop.xlane.xlu1 %852 }
 0x2d7   : > { %v873_v24 = vsub.f32 %v1777_v1, %v853_v23  ;;  %v850_v25 = vpop.xlane.xlu0 %849 }
 0x2d8   : > { %v872_v26 = vsub.f32 %v809_v4, %v850_v25 }
 0x2d9   : > { %v882_v27 = vmul.f32 1.442695, %v873_v24 }
 0x2da   : > { %v880_v28 = vmul.f32 1.442695, %v872_v26  ;;  %v931_v26 = vld [vmem:[#allocation4 + $0x18] sm:$0xff] }
 0x2db   : > { %1932 = vpow2.f32 %v882_v27 }
 0x2dc   : > { %1934 = vpow2.f32 %v880_v28 }
 0x2de   : > { %v859_v29 = vpop.xlane.xlu1 %858 }
 0x2df   : > { %v875_v30 = vsub.f32 %v1780_v9, %v859_v29 }
 0x2e1   : > { %v886_v31 = vmul.f32 1.442695, %v875_v30  ;;  %v932_v30 = vld [vmem:[#allocation4 + $0x20] sm:$0xff] }
 0x2e2   : > { %v856_v32 = vpop.xlane.xlu1 %855 }
 0x2e3   : > { %1936 = vpow2.f32 %v886_v31  ;;  %v874_v33 = vsub.f32 %v819_v10, %v856_v32 }
 0x2e5   : > { %v1933_v34 = vpop.eup %1932  ;;  %v884_v35 = vmul.f32 1.442695, %v874_v33  ;;  %v933_v33 = vld [vmem:[#allocation4 + $0x28] sm:$0xff] }
 0x2e6   : > { %v1935_v36 = vpop.eup %1934  ;;  %v865_v37 = vpop.xlane.xlu1 %864  ;;  %v899_v38 = vsel %vm404_vm2, %v1933_v34, 0.0 }
 0x2e7   : > { %1938 = vpow2.f32 %v884_v35  ;;  %v877_v39 = vsub.f32 %v1783_v15, %v865_v37  ;;  %900 = vadd.xlane.f32.xlu1 %v899_v38  ;;  %v896_v40 = vsel %vm404_vm2, %v1935_v36, 0.0  ;;  %v1875_v41 = vpack.c.bf16 %v1933_v34, %v1935_v36  ;;  %v934_v36 = vld [vmem:[#allocation4 + $0x30] sm:$0xff] }
 0x2e8   : > { %897 = vadd.xlane.f32.xlu0 %v896_v40 }
 0x2e9   : > { %v890_v42 = vmul.f32 1.442695, %v877_v39  ;;  %1876 = vmatprep.subr.bf16.mxu0 %v1875_v41  ;;  %1893 = vmatpush3.bf16.msra.mxu1 %v1875_v41  ;;  %v935_v39 = vld [vmem:[#allocation4 + $0x38] sm:$0xff] }
 0x2ea   : > { %1878 = vmatpush3.bf16.msra.mxu0 %v1875_v41  ;;  %v862_v43 = vpop.xlane.xlu1 %861  ;;  %1894 = vmatprep.subr.bf16.mxu1 %v1974_v2 }
 0x2eb   : > { %1940 = vpow2.f32 %v890_v42  ;;  %v876_v44 = vsub.f32 %v829_v16, %v862_v43 }
 0x2ed   : > { %v1937_v45 = vpop.eup %1936  ;;  %v888_v46 = vmul.f32 1.442695, %v876_v44 }
 0x2ee   : > { %v905_v47 = vsel %vm404_vm2, %v1937_v45, 0.0 }
 0x2ef   : > { %1942 = vpow2.f32 %v888_v46  ;;  %906 = vadd.xlane.f32.xlu1 %v905_v47  ;;  %v868_v48 = vpop.xlane.xlu1 %867  ;;  %v1218_v46 = vld [vmem:[%s2240_s4] sm:$0xff]  ;;  %v1223_v47 = vld [vmem:[%s2241_s5 + $0x8] sm:$0xff] }
 0x2f0   : > { %v878_v49 = vsub.f32 %v839_v20, %v868_v48  ;;  %v1222_v48 = vld [vmem:[%s2241_s5] sm:$0xff] }
 0x2f1   : > { %v1939_v50 = vpop.eup %1938 }
 0x2f2   : > { %v892_v51 = vmul.f32 1.442695, %v878_v49  ;;  %v902_v52 = vsel %vm404_vm2, %v1939_v50, 0.0  ;;  %v1879_v53 = vpack.c.bf16 %v1937_v45, %v1939_v50  ;;  %v1977_v49 = vmov 0   ;;  %v1224_v50 = vld [vmem:[%s2241_s5 + $0x10] sm:$0xff] }
 0x2f3   : > { %903 = vadd.xlane.f32.xlu0 %v902_v52  ;;  %v871_v54 = vpop.xlane.xlu1 %870  ;;  %v1085_v52 = vld [vmem:[#allocation6] sm:$0x1] }
 0x2f4   : > { %1944 = vpow2.f32 %v892_v51  ;;  %v879_v55 = vsub.f32 %v1786_v19, %v871_v54  ;;  %1880 = vmatprep.subr.bf16.mxu0 %v1879_v53  ;;  %1896 = vmatpush3.bf16.msra.mxu1 %v1879_v53  ;;  %v1225_v51 = vld [vmem:[%s2241_s5 + $0x18] sm:$0xff] }
 0x2f5   : > { %v1941_v56 = vpop.eup %1940  ;;  %1882 = vmatpush3.bf16.msra.mxu0 %v1879_v53  ;;  %1897 = vmatprep.subr.bf16.mxu1 %v1974_v2 }
 0x2f6   : > { %v894_v57 = vmul.f32 1.442695, %v879_v55  ;;  %v911_v58 = vsel %vm404_vm2, %v1941_v56, 0.0 }
 0x2f7   : > { %912 = vadd.xlane.f32.xlu1 %v911_v58 }
 0x2f8   : > { %1946 = vpow2.f32 %v894_v57  ;;  %v944_v57 = vld [vmem:[#allocation5] sm:$0xff] }
 0x2f9   : > { %v1943_v59 = vpop.eup %1942 }
 0x2fa   : > { %v908_v60 = vsel %vm404_vm2, %v1943_v59, 0.0  ;;  %v1883_v61 = vpack.c.bf16 %v1941_v56, %v1943_v59  ;;  %v945_v56 = vld [vmem:[#allocation5 + $0x8] sm:$0xff] }
 0x2fb   : > { %909 = vadd.xlane.f32.xlu0 %v908_v60 }
 0x2fc   : > { %1884 = vmatprep.subr.bf16.mxu0 %v1883_v61  ;;  %1899 = vmatpush3.bf16.msra.mxu1 %v1883_v61 }
 0x2fd   : > { %1886 = vmatpush3.bf16.msra.mxu0 %v1883_v61  ;;  %1900 = vmatprep.subr.bf16.mxu1 %v1974_v2 }
 0x2fe   : > { %v1945_v62 = vpop.eup %1944 }
 0x2ff   : > { %v914_v63 = vsel %vm404_vm2, %v1945_v62, 0.0 }
 0x300   : > { %915 = vadd.xlane.f32.xlu0 %v914_v63 }
 0x302   : > { %v1947_v0 = vpop.eup %1946 }
 0x303   : > { %v917_v1 = vsel %vm404_vm2, %v1947_v0, 0.0  ;;  %v1887_v4 = vpack.c.bf16 %v1947_v0, %v1945_v62  ;;  %v947_v0 = vld [vmem:[#allocation5 + $0x18] sm:$0xff] }
 0x304   : > { %918 = vadd.xlane.f32.xlu1 %v917_v1  ;;  %v1201_v1 = vlaneseq }
 0x305   : > { %1888 = vmatprep.subr.bf16.mxu0 %v1887_v4  ;;  %1902 = vmatpush3.bf16.msra.mxu1 %v1887_v4 }
 0x306   : > { %1890 = vmatpush3.bf16.msra.mxu0 %v1887_v4  ;;  %v946_v4 = vld [vmem:[#allocation5 + $0x10] sm:$0xff] }
 0x374   : > { %v901_v5 = vpop.xlane.xlu1 %900 }
 0x375   : > { %v898_v6 = vpop.xlane.xlu0 %897 }
 0x376   : > { %1948 = vrcp.f32 %v898_v6 }
 0x377   : > { %1950 = vrcp.f32 %v901_v5 }
 0x37c   : > { %v907_v10 = vpop.xlane.xlu1 %906 }
 0x380   : > { %v1949_v9 = vpop.eup %1948  ;;  %v904_v11 = vpop.xlane.xlu0 %903 }
 0x381   : > { %1952 = vrcp.f32 %v904_v11  ;;  %1086 = vxpose.xlu0.b32.start [1/8] (short) (narrow) %v1949_v9, 8  ;;  %v936_v15 = vmul.f32 %v1949_v9, %v928_v12  ;;  %v1951_v16 = vpop.eup %1950  ;;  %v2181_v11 = vshrl.u32 %v1201_v1, 7 }
 0x382   : > { %1954 = vrcp.f32 %v907_v10  ;;  %v937_v18 = vmul.f32 %v1951_v16, %v929_v17 }
 0x383   : > { %948 = vxpose.xlu1.b32.start [1/8] (short) (narrow) %v936_v15, 32  ;;  %v1203_v12 = vsub.s32 0, %v2181_v11 }
 0x384   : > { %v913_v19 = vpop.xlane.xlu1 %912 }
 0x385   : > { %1087 = vxpose.xlu0.b32.cont [2/8] (short) (narrow) %v1951_v16, 8 }
 0x387   : > { %949 = vxpose.xlu1.b32.cont [2/8] (short) (narrow) %v937_v18, 32 }
 0x388   : > { %v910_v20 = vpop.xlane.xlu0 %909 }
 0x389   : > { %1956 = vrcp.f32 %v910_v20 }
 0x38a   : > { %1958 = vrcp.f32 %v913_v19 }
 0x38b   : > { %v1953_v21 = vpop.eup %1952 }
 0x38c   : > { %1088 = vxpose.xlu0.b32.cont [3/8] (short) (narrow) %v1953_v21, 8  ;;  %v938_v23 = vmul.f32 %v1953_v21, %v930_v22  ;;  %v1955_v24 = vpop.eup %1954 }
 0x38d   : > { %v916_v25 = vpop.xlane.xlu0 %915  ;;  %v939_v27 = vmul.f32 %v1955_v24, %v931_v26 }
 0x38e   : > { %950 = vxpose.xlu1.b32.cont [3/8] (short) (narrow) %v938_v23, 32  ;;  %1960 = vrcp.f32 %v916_v25 }
 0x390   : > { %1089 = vxpose.xlu0.b32.cont [4/8] (short) (narrow) %v1955_v24, 8 }
 0x391   : > { %v919_v28 = vpop.xlane.xlu1 %918 }
 0x392   : > { %951 = vxpose.xlu1.b32.cont [4/8] (short) (narrow) %v939_v27, 32  ;;  %1962 = vrcp.f32 %v919_v28 }
 0x393   : > { %v1957_v29 = vpop.eup %1956 }
 0x394   : > { %1090 = vxpose.xlu0.b32.cont [5/8] (short) (narrow) %v1957_v29, 8  ;;  %v940_v31 = vmul.f32 %v1957_v29, %v932_v30  ;;  %v1959_v32 = vpop.eup %1958 }
 0x395   : > { %v941_v34 = vmul.f32 %v1959_v32, %v933_v33 }
 0x396   : > { %952 = vxpose.xlu1.b32.cont [5/8] (short) (narrow) %v940_v31, 32  ;;  %v1219_v31 = vld [vmem:[%s2240_s4 + $0x8] sm:$0xff] }
 0x398   : > { %1091 = vxpose.xlu0.b32.cont [6/8] (short) (narrow) %v1959_v32, 8  ;;  %v1961_v35 = vpop.eup %1960 }
 0x399   : > { %v942_v37 = vmul.f32 %v1961_v35, %v934_v36 }
 0x39a   : > { %953 = vxpose.xlu1.b32.cont [6/8] (short) (narrow) %v941_v34, 32 }
 0x39c   : > { %1092 = vxpose.xlu0.b32.cont [7/8] (short) (narrow) %v1961_v35, 8  ;;  %v1963_v38 = vpop.eup %1962 }
 0x39d   : > { %v943_v40 = vmul.f32 %v1963_v38, %v935_v39 }
 0x39e   : > { %954 = vxpose.xlu1.b32.cont [7/8] (short) (narrow) %v942_v37, 32 }
 0x3a0   : > { %1093 = vxpose.xlu0.b32.end [8/8] (short) (narrow) %v1963_v38, 8 }
 0x3a2   : > { %955 = vxpose.xlu1.b32.end [8/8] (short) (narrow) %v943_v40, 32 }
 0x3c0   : > { %1931 = vset.pattern.permute.xlu1 %v1977_v49 }
 0x3c1   : > { %1233 = vperm.xlu1 %1931, %v1223_v47  }
 0x3c5   : > { %1238 = vperm.xlu1 %1931, %v1224_v50  }
 0x3c9   : > { %1930 = vset.pattern.permute.xlu0 %v1977_v49 }
 0x3ca   : > { %1228 = vperm.xlu0 %1930, %v1222_v48  }
 0x3ce   : > { %1243 = vperm.xlu0 %1930, %v1225_v51  }
 0x404   : > { %v1102_v41 = vpop.trf.xlu0 }
 0x405   : > { %1826 = vmatmul.mubr.msk.f32.vlgmr.msra.gmra.mrb[16].mxu1 %vm404_vm2, %v1102_v41 }
 0x406   : > { %v964_v42 = vpop.trf.xlu1 }
 0x407   : > { %1803 = vmatprep.mubr.msk.f32.mxu0 %vm404_vm2, %v964_v42 }
 0x40a   : > { %v965_v43 = vpop.trf.xlu1 }
 0x40b   : > { %1804 = vmatmul.mubr.msk.f32.vlgmr.msra.gmra.mrb[10].mxu0 %vm404_vm2, %v965_v43 }
 0x40e   : > { %v966_v44 = vpop.trf.xlu1 }
 0x40f   : > { %1806 = vmatprep.mubr.msk.f32.mxu0 %vm404_vm2, %v966_v44 }
 0x412   : > { %v967_v45 = vpop.trf.xlu1 }
 0x413   : > { %1807 = vmatmul.mubr.msk.f32.gmra.mrb[12].mxu0 %vm404_vm2, %v967_v45 }
 0x414   : > { %1836 = vmatprep.mubr.msk.f32.mxu0 %vm330_vm1, %v1218_v46 }
 0x4d8   : > { %v1187_v53 = vpop.f32.mrb[16].mxu1 }
 0x4d9   : > { %v1191_v54 = vadd.f32 %v1187_v53, %v1085_v52  ;;  %v1827_v55 = vpop.f32.mrb[17].mxu1  ;;  %v1382_v53 = vadd.s32 8, %v2181_v11 }
 0x4da   : > { %v1383_v55 = vadd.s32 16, %v2181_v11 }
 0x4db   : > { %1192 = vst.msk [vmem:[#allocation6] sm:$0x1] %vm708_vm4, %v1191_v54  ;;  %v1386_v54 = vand.u32 127, %v1201_v1 }
 0x4dd   : > { %vm1387_vm5 = vcmp.eq.s32.totalorder %v2181_v11, %v1386_v54  ;;  %vm1388_vm6 = vcmp.eq.s32.totalorder %v1382_v53, %v1386_v54  ;;  %vm1389_vm7 = vcmp.eq.s32.totalorder %v1383_v55, %v1386_v54 }
 0x4de   : > { %v1805_v58 = vpop.f32.mrb[10].mxu0  ;;  %vm1912_vm8 = vmpackc.low %vm1388_vm6, %vm1387_vm5 }
 0x4df   : > { %v1078_v59 = vadd.f32 %v1805_v58, %v945_v56  ;;  %v1058_v60 = vpop.f32.mrb[11].mxu0  ;;  %v1384_v56 = vadd.s32 24, %v2181_v11 }
 0x4e0   : > { %v1077_v61 = vadd.f32 %v1058_v60, %v944_v57  ;;  %v1978_v57 = vmov 1.0|1.0  }
 0x4e1   : > { %1082 = vst.msk [vmem:[#allocation5 + $0x8] sm:$0xff] %vm404_vm2, %v1078_v59  ;;  %vm1390_vm9 = vcmp.eq.s32.totalorder %v1384_v56, %v1386_v54 }
 0x4e2   : > { %1081 = vst.msk [vmem:[#allocation5] sm:$0xff] %vm404_vm2, %v1077_v61  ;;  %v1193_v62 = vld [vmem:[#allocation6] sm:$0x1]  ;;  %vm1915_vm10 = vmpackc.low %vm1390_vm9, %vm1389_vm7 }
 0x4e3   : > { %v1194_v63 = vadd.f32 1e-09, %v1193_v62 }
 0x4e5   : > { %1964 = vrcp.f32 %v1194_v63 }
 0x4e6   : > { %v1808_v5 = vpop.f32.mrb[12].mxu0 }
 0x4e7   : > { %v1080_v6 = vadd.f32 %v1808_v5, %v947_v0  ;;  %v1068_v9 = vpop.f32.mrb[13].mxu0 }
 0x4e8   : > { %v1079_v10 = vadd.f32 %v1068_v9, %v946_v4  ;;  %v1197_v19 = vld [vmem:[#allocation5 + $0x8] sm:$0xff] }
 0x4e9   : > { %1084 = vst.msk [vmem:[#allocation5 + $0x18] sm:$0xff] %vm404_vm2, %v1080_v6  ;;  %v1196_v18 = vld [vmem:[#allocation5] sm:$0xff] }
 0x4ea   : > { %1083 = vst.msk [vmem:[#allocation5 + $0x10] sm:$0xff] %vm404_vm2, %v1079_v10 }
 0x4ef   : > { %v1965_v15 = vpop.eup %1964 }
 0x4f0   : > { %v1204_v16 = vrot.slane %v1965_v15, %v1203_v12  ;;  %v1199_v17 = vld [vmem:[#allocation5 + $0x18] sm:$0xff] }
 0x4f1   : > { %v1198_v20 = vld [vmem:[#allocation5 + $0x10] sm:$0xff] }
 0x4f2   : > { %v1206_v21 = vmul.f32 %v1204_v16, %v1196_v18  ;;  %v1207_v22 = vmul.f32 %v1204_v16, %v1197_v19  ;;  %v1208_v23 = vmul.f32 %v1204_v16, %v1198_v20  ;;  %v1209_v24 = vmul.f32 %v1204_v16, %v1199_v17 }
 0x4f4   : > { %v1214_v25 = vsub.f32 %v2050_v7, %v1206_v21  ;;  %v1215_v26 = vsub.f32 %v2052_v8, %v1207_v22  ;;  %v1216_v27 = vsub.f32 %v2063_v13, %v1208_v23  ;;  %v1217_v28 = vsub.f32 %v2065_v14, %v1209_v24  ;;  %v1220_v7 = vld [vmem:[%s2240_s4 + $0x10] sm:$0xff]  ;;  %v1221_v8 = vld [vmem:[%s2240_s4 + $0x18] sm:$0xff]  ;;  %v1229_v13 = vpop.permute.xlu0 %1228  ;;  %v1234_v14 = vpop.permute.xlu1 %1233 }
 0x4f6   : > { %v1903_v29 = vpack.c.bf16 %v1215_v26, %v1214_v25  ;;  %v1907_v30 = vpack.c.bf16 %v1217_v28, %v1216_v27 }
 0x4f8   : > { %1904 = vmatprep.subr.bf16.mxu0 %v1903_v29  ;;  %v1244_v37 = vpop.permute.xlu0 %1243  ;;  %v1239_v41 = vpop.permute.xlu1 %1238 }
 0x4f9   : > { %1906 = vmatpush3.bf16.msra.mxu0 %v1903_v29 }
 0x4fa   : > { %1908 = vmatprep.subr.bf16.mxu0 %v1907_v30 }
 0x4fd   : > { %1910 = vmatpush3.bf16.msra.mxu0 %v1907_v30 }
 0x4fe   : > { %1911 = vmatprep.subr.bf16.mxu0 %v1974_v2 }
 0x500   : > { %1837 = vmatmul.mubr.msk.f32.vlgmr.msra.gmra.mrb[14].mxu0 %vm330_vm1, %v1219_v31 }
 0x501   : > { %1839 = vmatprep.mubr.msk.f32.mxu0 %vm330_vm1, %v1220_v7  ;;  %1913 = vmatpush3.bf16.msk.msra.mxu0 %vm1912_vm8, %v1978_v57 }
 0x502   : > { %1914 = vmatprep.subr.bf16.mxu0 %v1974_v2 }
 0x504   : > { %1840 = vmatmul.mubr.msk.f32.gmra.mrb[16].mxu0 %vm330_vm1, %v1221_v8 }
 0x505   : > { %1850 = vmatprep.mubr.msk.f32.mxu0 %vm1975_vm0, %v1976_v3  ;;  %1916 = vmatpush3.bf16.msk.msra.mxu0 %vm1915_vm10, %v1978_v57 }
 0x5d3   : > { %v1838_v32 = vpop.f32.mrb[14].mxu0 }
 0x5d4   : > { %v1330_v33 = vadd.f32 %v1838_v32, %v1234_v14  ;;  %v1324_v34 = vpop.f32.mrb[15].mxu0 }
 0x5d5   : > { %v1325_v35 = vadd.f32 %v1324_v34, %v1229_v13 }
 0x5d6   : > { %1344 = vst.msk [vmem:[%s285_s23 + $0x8] sm:$0xff] %vm404_vm2, %v1330_v33  ;;  %v1350_v36 = vsel %vm404_vm2, %v1330_v33, 0.0  ;;  %v1360_v40 = vmul.f32 %v1330_v33, %v1330_v33 }
 0x5d7   : > { %1343 = vst.msk [vmem:[%s285_s23] sm:$0xff] %vm404_vm2, %v1325_v35  ;;  %v1841_v38 = vpop.f32.mrb[16].mxu0  ;;  %1351 = vadd.xlane.f32.xlu0 %v1350_v36  ;;  %v1347_v3 = vsel %vm404_vm2, %v1325_v35, 0.0  ;;  %v1359_v39 = vmul.f32 %v1325_v35, %v1325_v35 }
 0x5d8   : > { %v1340_v42 = vadd.f32 %v1841_v38, %v1244_v37  ;;  %v1334_v43 = vpop.f32.mrb[17].mxu0  ;;  %1348 = vadd.xlane.f32.xlu1 %v1347_v3  ;;  %v1366_v46 = vsel %vm404_vm2, %v1360_v40, 0.0 }
 0x5d9   : > { %v1335_v44 = vadd.f32 %v1334_v43, %v1239_v41  ;;  %v1363_v45 = vsel %vm404_vm2, %v1359_v39, 0.0 }
 0x5da   : > { %1346 = vst.msk [vmem:[%s285_s23 + $0x18] sm:$0xff] %vm404_vm2, %v1340_v42  ;;  %v1362_v50 = vmul.f32 %v1340_v42, %v1340_v42  ;;  %v1356_v51 = vsel %vm404_vm2, %v1340_v42, 0.0 }
 0x5db   : > { %1345 = vst.msk [vmem:[%s285_s23 + $0x10] sm:$0xff] %vm404_vm2, %v1335_v44  ;;  %1364 = vadd.xlane.f32.xlu0 %v1363_v45  ;;  %v1361_v47 = vmul.f32 %v1335_v44, %v1335_v44  ;;  %v1353_v48 = vsel %vm404_vm2, %v1335_v44, 0.0 }
 0x5dc   : > { %1367 = vadd.xlane.f32.xlu1 %v1366_v46  ;;  %v1372_v52 = vsel %vm404_vm2, %v1362_v50, 0.0 }
 0x5dd   : > { %v1369_v49 = vsel %vm404_vm2, %v1361_v47, 0.0 }
 0x5df   : > { %1354 = vadd.xlane.f32.xlu0 %v1353_v48 }
 0x5e0   : > { %1370 = vadd.xlane.f32.xlu1 %v1369_v49 }
 0x5e3   : > { %1357 = vadd.xlane.f32.xlu0 %v1356_v51 }
 0x5e4   : > { %1373 = vadd.xlane.f32.xlu1 %v1372_v52 }
 0x664   : > { %v1352_v58 = vpop.xlane.xlu0 %1351 }
 0x665   : > { %v1349_v59 = vpop.xlane.xlu1 %1348 }
 0x668   : > { %v1365_v60 = vpop.xlane.xlu0 %1364 }
 0x669   : > { %v1376_v61 = vsel %vm1375_vm11, %v1349_v59, %v1365_v60  ;;  %v1368_v62 = vpop.xlane.xlu1 %1367 }
 0x66a   : > { %1399 = vxpose.xlu0.b32.start [1/4] (short) (narrow) %v1376_v61, 8  ;;  %v1377_v0 = vsel %vm1375_vm11, %v1352_v58, %v1368_v62 }
 0x66c   : > { %v1355_v63 = vpop.xlane.xlu0 %1354 }
 0x66d   : > { %v1371_v1 = vpop.xlane.xlu1 %1370 }
 0x66e   : > { %1400 = vxpose.xlu0.b32.cont [2/4] (short) (narrow) %v1377_v0, 8  ;;  %v1378_v4 = vsel %vm1375_vm11, %v1355_v63, %v1371_v1 }
 0x670   : > { %v1358_v5 = vpop.xlane.xlu0 %1357 }
 0x671   : > { %v1374_v6 = vpop.xlane.xlu1 %1373 }
 0x672   : > { %1401 = vxpose.xlu0.b32.cont [3/4] (short) (narrow) %v1378_v4, 8  ;;  %v1379_v9 = vsel %vm1375_vm11, %v1358_v5, %v1374_v6 }
 0x676   : > { %1402 = vxpose.xlu0.b32.end [4/4] (short) (narrow) %v1379_v9, 8 }
 0x6ea   : > { %v1415_v2 = vpop.trf.xlu0 }
 0x6eb   : > { %1851 = vmatmul.mubr.msk.f32.vlgmr.msra.gmra.mrb[18].mxu0 %vm330_vm1, %v1415_v2 }
 0x7be   : > { %v1500_v10 = vpop.f32.mrb[18].mxu0 }
 0x7bf   : > { %1505 = vst.msk [vmem:[%s289_s28] sm:$0x3] %vm1504_vm12, %v1500_v10  ;;  %v1852_v11 = vpop.f32.mrb[19].mxu0 }
 0x7c0 PF: > { %s18_s24 = sadd.s32 1, %s1972_s24  }
 0x7c1   : > { %p15_p4 = scmp.ge.s32.totalorder %s18_s24, 4  }
 0x7c3   :  { %17 = sbr.rel (!%p15_p4) target bundleno = 1 (0x1), region = 86 }

</bundles_post_ra>
